<compile_context>
chip_gen: v5e
topology: v5e:2x2
jax: 0.10.0
libtpu: 0.0.40
codegen_flags: <defaults>
</compile_context>

<pallas_src>
import jax
import jax.numpy as jnp
from jax.experimental import pallas as pl
from jax.experimental.pallas import tpu as pltpu

EPS = 1e-5
NEG_SLOPE = 0.2


def _round_up(n, m):
    return ((n + m - 1) // m) * m


def _leaky_relu(x):
    return jnp.maximum(x, NEG_SLOPE * x)


def _make_kernel(tile_b, true_batch, n2, n3, out_pad):
    """Builds the fused generator kernel, closing over static sizes."""
    inv_b = 1.0 / float(true_batch)
    # Static lane offsets into the packed per-feature slab [g2|be2|g3|be3|b4];
    # all offsets are multiples of 128 -> free static slices.
    o_g2, o_be2 = 0, n2
    o_g3, o_be3 = 2 * n2, 2 * n2 + n3
    o_b4 = 2 * n2 + 2 * n3

    def _scale_shift(sum_ref, sq_ref, gamma, beta):
        # Fold mean / rsqrt(var) / gamma / beta into one per-feature mul+add.
        mean = sum_ref[...] * inv_b
        var = jnp.maximum(sq_ref[...] * inv_b - mean * mean, 0.0)
        scale = gamma * jax.lax.rsqrt(var + EPS)
        return scale, beta - mean * scale

    def kernel(z_ref, w1_ref, w2_ref, w3_ref, w4_ref, vec_ref, out_ref,
               sum2_ref, sq2_ref, sum3_ref, sq3_ref):
        p = pl.program_id(0)   # phase: 0 = BN2 stats, 1 = BN3 stats, 2 = emit
        t = pl.program_id(1)   # batch tile

        @pl.when((p == 0) & (t == 0))
        def _():
            sum2_ref[...] = jnp.zeros_like(sum2_ref)
            sq2_ref[...] = jnp.zeros_like(sq2_ref)

        @pl.when((p == 1) & (t == 0))
        def _():
            sum3_ref[...] = jnp.zeros_like(sum3_ref)
            sq3_ref[...] = jnp.zeros_like(sq3_ref)

        # Mask of real (non-padded) batch rows for the BN reductions.
        rows = jax.lax.broadcasted_iota(jnp.int32, (tile_b, 1), 0) + t * tile_b
        mask = (rows < true_batch).astype(jnp.float32)

        # Linear1 (+b1 via the 1.0 bias lane folded into w1) + LeakyReLU, then
        # Linear2 (b2 exactly cancelled by train-mode BN).  Recomputed every
        # phase; weights are grid-resident so this is pure MXU work.
        h1 = _leaky_relu(jnp.dot(z_ref[...], w1_ref[...],
                                 preferred_element_type=jnp.float32))
        h2p = jnp.dot(h1.astype(jnp.bfloat16), w2_ref[...],
                      preferred_element_type=jnp.float32)

        @pl.when(p == 0)
        def _():
            m = h2p * mask
            sum2_ref[...] += jnp.sum(m, axis=0, keepdims=True)
            sq2_ref[...] += jnp.sum(m * m, axis=0, keepdims=True)

        @pl.when(p > 0)
        def _():
            g2 = vec_ref[:, o_g2:o_g2 + n2]
            be2 = vec_ref[:, o_be2:o_be2 + n2]
            sc2, sh2 = _scale_shift(sum2_ref, sq2_ref, g2, be2)
            h2 = _leaky_relu(h2p * sc2 + sh2)
            h3p = jnp.dot(h2.astype(jnp.bfloat16), w3_ref[...],
                          preferred_element_type=jnp.float32)

            @pl.when(p == 1)
            def _():
                m = h3p * mask
                sum3_ref[...] += jnp.sum(m, axis=0, keepdims=True)
                sq3_ref[...] += jnp.sum(m * m, axis=0, keepdims=True)

            @pl.when(p == 2)
            def _():
                g3 = vec_ref[:, o_g3:o_g3 + n3]
                be3 = vec_ref[:, o_be3:o_be3 + n3]
                sc3, sh3 = _scale_shift(sum3_ref, sq3_ref, g3, be3)
                h3 = _leaky_relu(h3p * sc3 + sh3)
                b4 = vec_ref[:, o_b4:o_b4 + out_pad]
                o = jnp.dot(h3.astype(jnp.bfloat16), w4_ref[...],
                            preferred_element_type=jnp.float32) + b4
                out_ref[...] = jnp.tanh(o)

    return kernel


def low_res_generator(z, kernel_params, img_shape, *, max_tile_b=1024):
    """z: (batch, latent_dim) f32. kernel_params: output of prepare_kernel_params."""
    w1p, w2b, w3b, w4b, vec = kernel_params
    batch, latent = z.shape
    lat_pad, n1 = w1p.shape
    n2 = w2b.shape[1]
    n3 = w3b.shape[1]
    out_pad = w4b.shape[1]

    # Batch tile: multiple of 16 rows, capped against v7x VMEM (64 MiB total /
    # 32 MiB scoped).  Small batches collapse to a single tile.
    tile_b = min(_round_up(max_tile_b, 16), _round_up(max(batch, 1), 16))
    b_pad = _round_up(batch, tile_b)
    nb = b_pad // tile_b

    zp = jnp.zeros((b_pad, lat_pad), jnp.float32)
    zp = zp.at[:batch, :latent].set(z)
    zp = zp.at[:batch, latent].set(1.0)   # bias lane feeding the folded b1 row
    zp = zp.astype(jnp.bfloat16)

    kernel = _make_kernel(tile_b, batch, n2, n3, out_pad)

    out = pl.pallas_call(
        kernel,
        out_shape=jax.ShapeDtypeStruct((b_pad, out_pad), jnp.float32),
        grid_spec=pltpu.PrefetchScalarGridSpec(
            num_scalar_prefetch=0,
            grid=(3, nb),   # (phase, batch tile)
            in_specs=[
                pl.BlockSpec((tile_b, lat_pad), lambda p, t: (t, 0)),    # z
                pl.BlockSpec((lat_pad, n1), lambda p, t: (0, 0)),        # w1(+b1)
                pl.BlockSpec((n1, n2), lambda p, t: (0, 0)),             # w2
                pl.BlockSpec((n2, n3), lambda p, t: (0, 0)),             # w3
                pl.BlockSpec((n3, out_pad), lambda p, t: (0, 0)),        # w4
                pl.BlockSpec((1, vec.shape[1]), lambda p, t: (0, 0)),    # g2|be2|g3|be3|b4
            ],
            out_specs=pl.BlockSpec((tile_b, out_pad), lambda p, t: (t, 0)),
            scratch_shapes=[
                pltpu.VMEM((1, n2), jnp.float32),   # BN2 sum
                pltpu.VMEM((1, n2), jnp.float32),   # BN2 sum of squares
                pltpu.VMEM((1, n3), jnp.float32),   # BN3 sum
                pltpu.VMEM((1, n3), jnp.float32),   # BN3 sum of squares
            ]),
        compiler_params=pltpu.CompilerParams(
            # Both axes are sequential: tiles accumulate BN partial sums and
            # phases are ordered (see v7x TODO in the header).
            dimension_semantics=("arbitrary", "arbitrary"),
            vmem_limit_bytes=32 * 1024 * 1024),
    )(zp, w1p, w2b, w3b, w4b, vec)
    return out[:batch, :img_shape]


def init_params(key, latent_dim, img_shape):
    """PyTorch-default init, stored transposed: W (in, out), b/gamma/beta (1, out)."""
    dims = [(latent_dim, 128), (128, 256), (256, 512), (512, img_shape)]
    keys = jax.random.split(key, 2 * len(dims))
    params = []
    bn_after = {1: True, 2: True}
    for li, (fan_in, fan_out) in enumerate(dims):
        bound = 1.0 / float(fan_in) ** 0.5
        w = jax.random.uniform(keys[2 * li], (fan_in, fan_out), jnp.float32,
                               minval=-bound, maxval=bound)
        b = jax.random.uniform(keys[2 * li + 1], (1, fan_out), jnp.float32,
                               minval=-bound, maxval=bound)
        params += [w, b]
        if bn_after.get(li, False):
            params += [jnp.ones((1, fan_out), jnp.float32),
                       jnp.zeros((1, fan_out), jnp.float32)]
    return tuple(params)


def prepare_kernel_params(params, latent_dim, img_shape):
    """Pad to lane-aligned shapes, cast weights to bf16, fold b1 into w1,
    drop BN-cancelled biases, pack per-feature vectors into one slab."""
    (w1, b1, w2, b2, g2, be2, w3, b3, g3, be3, w4, b4) = params
    lat_pad = _round_up(latent_dim + 1, 128)   # +1: bias lane for folded b1
    out_pad = _round_up(img_shape, 128)
    w1p = jnp.zeros((lat_pad, w1.shape[1]), jnp.float32)
    w1p = w1p.at[:latent_dim, :].set(w1)
    w1p = w1p.at[latent_dim, :].set(b1[0])     # b1 folded into the bias-lane row
    w4p = jnp.pad(w4, ((0, 0), (0, out_pad - img_shape)))
    b4p = jnp.pad(b4, ((0, 0), (0, out_pad - img_shape)))
    vec = jnp.concatenate([g2, be2, g3, be3, b4p], axis=1)   # (1, 2*256+2*512+out_pad)
    # b2 / b3 intentionally dropped: exactly cancelled by training-mode BN mean.
    return (w1p.astype(jnp.bfloat16), w2.astype(jnp.bfloat16),
            w3.astype(jnp.bfloat16), w4p.astype(jnp.bfloat16), vec)


def reference_forward(z, params):
    """Pure-f32 reference with the original PyTorch semantics (biases included)."""
    (w1, b1, w2, b2, g2, be2, w3, b3, g3, be3, w4, b4) = params

    def bn(x, g, b):
        mean = jnp.mean(x, axis=0, keepdims=True)
        var = jnp.mean((x - mean) ** 2, axis=0, keepdims=True)
        return (x - mean) * jax.lax.rsqrt(var + EPS) * g + b

    def lrelu(x):
        return jnp.where(x > 0, x, NEG_SLOPE * x)

    h = lrelu(z @ w1 + b1)
    h = lrelu(bn(h @ w2 + b2, g2, be2))
    h = lrelu(bn(h @ w3 + b3, g3, be3))
    return jnp.tanh(h @ w4 + b4)


if __name__ == "__main__":
    latent_dim = 100
    img_shape = 64      # small flattened image size
    batch = 40          # not a multiple of the tile -> exercises the BN row mask

    key = jax.random.PRNGKey(0)
    k_z, k_p = jax.random.split(key)
    z = jax.random.normal(k_z, (batch, latent_dim), jnp.float32)
    params = init_params(k_p, latent_dim, img_shape)
    kparams = prepare_kernel_params(params, latent_dim, img_shape)

    # Small max_tile_b so the demo runs several batch tiles (exercises the
    # cross-tile BN partial-sum exchange); production would keep the default.
    out = low_res_generator(z, kparams, img_shape, max_tile_b=16)
    out = jax.block_until_ready(out)

    ref = reference_forward(z, params)
    assert out.shape == (batch, img_shape)
    # bf16 weights/activations into the MXU -> compare against the f32 reference
    # with a tolerance covering bf16 quantization (output is tanh-bounded).
    assert jnp.allclose(out, ref, atol=3e-2, rtol=3e-2), (
        f"max abs err {float(jnp.max(jnp.abs(out - ref)))}")

    print("KERNEL_OK")
</pallas_src>

<mosaic_0001>
module attributes {stable_mosaic.version = 11 : i64} {
  func.func @kernel(%arg0: i32, %arg1: i32, %arg2: memref<16x128xbf16, #tpu.memory_space<vmem>>, %arg3: memref<128x128xbf16, #tpu.memory_space<vmem>>, %arg4: memref<128x256xbf16, #tpu.memory_space<vmem>>, %arg5: memref<256x512xbf16, #tpu.memory_space<vmem>>, %arg6: memref<512x128xbf16, #tpu.memory_space<vmem>>, %arg7: memref<1x1664xf32, #tpu.memory_space<vmem>>, %arg8: memref<16x128xf32, #tpu.memory_space<vmem>>, %arg9: memref<1x256xf32, #tpu.memory_space<vmem>>, %arg10: memref<1x256xf32, #tpu.memory_space<vmem>>, %arg11: memref<1x512xf32, #tpu.memory_space<vmem>>, %arg12: memref<1x512xf32, #tpu.memory_space<vmem>>) attributes {dimension_semantics = [#tpu.dimension_semantics<arbitrary>, #tpu.dimension_semantics<arbitrary>], iteration_bounds = array<i64: 3, 3>, scalar_prefetch = 0 : i64, scratch_operands = 4 : i64, tpu.core_type = #tpu.core_type<tc>, window_params = [{transform_indices = @transform_0, window_bounds = array<i64: 16, 128>}, {pipeline_mode = #tpu.pipeline_mode<synchronous>, transform_indices = @transform_1, window_bounds = array<i64: 128, 128>}, {pipeline_mode = #tpu.pipeline_mode<synchronous>, transform_indices = @transform_2, window_bounds = array<i64: 128, 256>}, {pipeline_mode = #tpu.pipeline_mode<synchronous>, transform_indices = @transform_3, window_bounds = array<i64: 256, 512>}, {pipeline_mode = #tpu.pipeline_mode<synchronous>, transform_indices = @transform_4, window_bounds = array<i64: 512, 128>}, {pipeline_mode = #tpu.pipeline_mode<synchronous>, transform_indices = @transform_5, window_bounds = array<i64: 1, 1664>}, {transform_indices = @transform_6, window_bounds = array<i64: 16, 128>}]} {
    %c0_i32 = arith.constant 0 : i32
    %0 = arith.cmpi eq, %arg0, %c0_i32 : i32
    %c0_i32_0 = arith.constant 0 : i32
    %1 = arith.cmpi eq, %arg1, %c0_i32_0 : i32
    %2 = arith.andi %0, %1 : i1
    %3 = arith.extui %2 : i1 to i32
    %c0_i32_1 = arith.constant 0 : i32
    %4 = arith.cmpi ne, %3, %c0_i32_1 : i32
    scf.if %4 {
      %cst_15 = arith.constant 0.000000e+00 : f32
      %33 = vector.broadcast %cst_15 : f32 to vector<1x256xf32>
      %c0_16 = arith.constant 0 : index
      %c0_17 = arith.constant 0 : index
      %34 = vector.load %arg9[%c0_16, %c0_17] : memref<1x256xf32, #tpu.memory_space<vmem>>, vector<1x256xf32>
      tpu.vector_store %arg9[%c0_16, %c0_17], %33 {strides = array<i32>} : memref<1x256xf32, #tpu.memory_space<vmem>>, vector<1x256xf32>,
      %cst_18 = arith.constant 0.000000e+00 : f32
      %35 = vector.broadcast %cst_18 : f32 to vector<1x256xf32>
      %c0_19 = arith.constant 0 : index
      %c0_20 = arith.constant 0 : index
      %36 = vector.load %arg10[%c0_19, %c0_20] : memref<1x256xf32, #tpu.memory_space<vmem>>, vector<1x256xf32>
      tpu.vector_store %arg10[%c0_19, %c0_20], %35 {strides = array<i32>} : memref<1x256xf32, #tpu.memory_space<vmem>>, vector<1x256xf32>,
    } else {
    }
    %c1_i32 = arith.constant 1 : i32
    %5 = arith.cmpi eq, %arg0, %c1_i32 : i32
    %c0_i32_2 = arith.constant 0 : i32
    %6 = arith.cmpi eq, %arg1, %c0_i32_2 : i32
    %7 = arith.andi %5, %6 : i1
    %8 = arith.extui %7 : i1 to i32
    %c0_i32_3 = arith.constant 0 : i32
    %9 = arith.cmpi ne, %8, %c0_i32_3 : i32
    scf.if %9 {
      %cst_15 = arith.constant 0.000000e+00 : f32
      %33 = vector.broadcast %cst_15 : f32 to vector<1x512xf32>
      %c0_16 = arith.constant 0 : index
      %c0_17 = arith.constant 0 : index
      %34 = vector.load %arg11[%c0_16, %c0_17] : memref<1x512xf32, #tpu.memory_space<vmem>>, vector<1x512xf32>
      tpu.vector_store %arg11[%c0_16, %c0_17], %33 {strides = array<i32>} : memref<1x512xf32, #tpu.memory_space<vmem>>, vector<1x512xf32>,
      %cst_18 = arith.constant 0.000000e+00 : f32
      %35 = vector.broadcast %cst_18 : f32 to vector<1x512xf32>
      %c0_19 = arith.constant 0 : index
      %c0_20 = arith.constant 0 : index
      %36 = vector.load %arg12[%c0_19, %c0_20] : memref<1x512xf32, #tpu.memory_space<vmem>>, vector<1x512xf32>
      tpu.vector_store %arg12[%c0_19, %c0_20], %35 {strides = array<i32>} : memref<1x512xf32, #tpu.memory_space<vmem>>, vector<1x512xf32>,
    } else {
    }
    %10 = tpu.iota {dimensions = array<i32: 0>} : vector<16x1xi32>
    %c16_i32 = arith.constant 16 : i32
    %11 = arith.muli %arg1, %c16_i32 : i32
    %12 = vector.broadcast %11 : i32 to vector<16x1xi32>
    %13 = arith.addi %10, %12 : vector<16x1xi32>
    %c40_i32 = arith.constant 40 : i32
    %14 = vector.broadcast %c40_i32 : i32 to vector<16x1xi32>
    %15 = arith.cmpi slt, %13, %14 : vector<16x1xi32>
    %16 = arith.extui %15 : vector<16x1xi1> to vector<16x1xi32>
    %17 = arith.sitofp %16 : vector<16x1xi32> to vector<16x1xf32>
    %c0 = arith.constant 0 : index
    %c0_4 = arith.constant 0 : index
    %18 = vector.load %arg2[%c0, %c0_4] : memref<16x128xbf16, #tpu.memory_space<vmem>>, vector<16x128xbf16>
    %c0_5 = arith.constant 0 : index
    %c0_6 = arith.constant 0 : index
    %19 = vector.load %arg3[%c0_5, %c0_6] : memref<128x128xbf16, #tpu.memory_space<vmem>>, vector<128x128xbf16>
    %cst = arith.constant dense<0.000000e+00> : vector<16x128xf32>
    %20 = tpu.matmul %18, %19, %cst {dimension_numbers = #tpu.dot_dimension_numbers<[1], [0], [0], [1], [0, 0, 1, 1], [], []>} : vector<16x128xbf16>, vector<128x128xbf16>, vector<16x128xf32> -> vector<16x128xf32>
    %cst_7 = arith.constant 2.000000e-01 : f32
    %21 = vector.broadcast %cst_7 : f32 to vector<16x128xf32>
    %22 = arith.mulf %21, %20 : vector<16x128xf32>
    %23 = arith.maximumf %20, %22 : vector<16x128xf32>
    %24 = arith.truncf %23 : vector<16x128xf32> to vector<16x128xbf16>
    %c0_8 = arith.constant 0 : index
    %c0_9 = arith.constant 0 : index
    %25 = vector.load %arg4[%c0_8, %c0_9] : memref<128x256xbf16, #tpu.memory_space<vmem>>, vector<128x256xbf16>
    %cst_10 = arith.constant dense<0.000000e+00> : vector<16x256xf32>
    %26 = tpu.matmul %24, %25, %cst_10 {dimension_numbers = #tpu.dot_dimension_numbers<[1], [0], [0], [1], [0, 0, 1, 1], [], []>} : vector<16x128xbf16>, vector<128x256xbf16>, vector<16x256xf32> -> vector<16x256xf32>
    %c0_i32_11 = arith.constant 0 : i32
    %27 = arith.cmpi eq, %arg0, %c0_i32_11 : i32
    %28 = arith.extui %27 : i1 to i32
    %c0_i32_12 = arith.constant 0 : i32
    %29 = arith.cmpi ne, %28, %c0_i32_12 : i32
    scf.if %29 {
      %33 = vector.broadcast %17 : vector<16x1xf32> to vector<16x256xf32>
      %34 = arith.mulf %26, %33 : vector<16x256xf32>
      %c0_15 = arith.constant 0 : index
      %c0_16 = arith.constant 0 : index
      %35 = vector.load %arg9[%c0_15, %c0_16] : memref<1x256xf32, #tpu.memory_space<vmem>>, vector<1x256xf32>
      %cst_17 = arith.constant dense<0.000000e+00> : vector<256xf32>
      %36 = vector.multi_reduction <add>, %34, %cst_17 [0] : vector<16x256xf32> to vector<256xf32>
      %37 = vector.shape_cast %36 : vector<256xf32> to vector<1x256xf32>
      %38 = arith.addf %35, %37 : vector<1x256xf32>
      %c0_18 = arith.constant 0 : index
      %c0_19 = arith.constant 0 : index
      %39 = vector.load %arg9[%c0_18, %c0_19] : memref<1x256xf32, #tpu.memory_space<vmem>>, vector<1x256xf32>
      tpu.vector_store %arg9[%c0_18, %c0_19], %38 {strides = array<i32>} : memref<1x256xf32, #tpu.memory_space<vmem>>, vector<1x256xf32>,
      %c0_20 = arith.constant 0 : index
      %c0_21 = arith.constant 0 : index
      %40 = vector.load %arg10[%c0_20, %c0_21] : memref<1x256xf32, #tpu.memory_space<vmem>>, vector<1x256xf32>
      %41 = arith.mulf %34, %34 : vector<16x256xf32>
      %cst_22 = arith.constant dense<0.000000e+00> : vector<256xf32>
      %42 = vector.multi_reduction <add>, %41, %cst_22 [0] : vector<16x256xf32> to vector<256xf32>
      %43 = vector.shape_cast %42 : vector<256xf32> to vector<1x256xf32>
      %44 = arith.addf %40, %43 : vector<1x256xf32>
      %c0_23 = arith.constant 0 : index
      %c0_24 = arith.constant 0 : index
      %45 = vector.load %arg10[%c0_23, %c0_24] : memref<1x256xf32, #tpu.memory_space<vmem>>, vector<1x256xf32>
      tpu.vector_store %arg10[%c0_23, %c0_24], %44 {strides = array<i32>} : memref<1x256xf32, #tpu.memory_space<vmem>>, vector<1x256xf32>,
    } else {
    }
    %c0_i32_13 = arith.constant 0 : i32
    %30 = arith.cmpi sgt, %arg0, %c0_i32_13 : i32
    %31 = arith.extui %30 : i1 to i32
    %c0_i32_14 = arith.constant 0 : i32
    %32 = arith.cmpi ne, %31, %c0_i32_14 : i32
    scf.if %32 {
      %c0_15 = arith.constant 0 : index
      %c0_16 = arith.constant 0 : index
      %33 = vector.load %arg7[%c0_15, %c0_16] : memref<1x1664xf32, #tpu.memory_space<vmem>>, vector<1x256xf32>
      %c0_17 = arith.constant 0 : index
      %c256 = arith.constant 256 : index
      %34 = vector.load %arg7[%c0_17, %c256] : memref<1x1664xf32, #tpu.memory_space<vmem>>, vector<1x256xf32>
      %c0_18 = arith.constant 0 : index
      %c0_19 = arith.constant 0 : index
      %35 = vector.load %arg9[%c0_18, %c0_19] : memref<1x256xf32, #tpu.memory_space<vmem>>, vector<1x256xf32>
      %cst_20 = arith.constant 2.500000e-02 : f32
      %36 = vector.broadcast %cst_20 : f32 to vector<1x256xf32>
      %37 = arith.mulf %35, %36 : vector<1x256xf32>
      %c0_21 = arith.constant 0 : index
      %c0_22 = arith.constant 0 : index
      %38 = vector.load %arg10[%c0_21, %c0_22] : memref<1x256xf32, #tpu.memory_space<vmem>>, vector<1x256xf32>
      %cst_23 = arith.constant 2.500000e-02 : f32
      %39 = vector.broadcast %cst_23 : f32 to vector<1x256xf32>
      %40 = arith.mulf %38, %39 : vector<1x256xf32>
      %41 = arith.mulf %37, %37 : vector<1x256xf32>
      %42 = arith.subf %40, %41 : vector<1x256xf32>
      %cst_24 = arith.constant 0.000000e+00 : f32
      %43 = vector.broadcast %cst_24 : f32 to vector<1x256xf32>
      %44 = arith.maximumf %42, %43 : vector<1x256xf32>
      %cst_25 = arith.constant 9.99999974E-6 : f32
      %45 = vector.broadcast %cst_25 : f32 to vector<1x256xf32>
      %46 = arith.addf %44, %45 : vector<1x256xf32>
      %47 = math.rsqrt %46 : vector<1x256xf32>
      %48 = arith.mulf %33, %47 : vector<1x256xf32>
      %49 = arith.mulf %37, %48 : vector<1x256xf32>
      %50 = arith.subf %34, %49 : vector<1x256xf32>
      %51 = vector.broadcast %48 : vector<1x256xf32> to vector<16x256xf32>
      %52 = arith.mulf %26, %51 : vector<16x256xf32>
      %53 = vector.broadcast %50 : vector<1x256xf32> to vector<16x256xf32>
      %54 = arith.addf %52, %53 : vector<16x256xf32>
      %cst_26 = arith.constant 2.000000e-01 : f32
      %55 = vector.broadcast %cst_26 : f32 to vector<16x256xf32>
      %56 = arith.mulf %55, %54 : vector<16x256xf32>
      %57 = arith.maximumf %54, %56 : vector<16x256xf32>
      %58 = arith.truncf %57 : vector<16x256xf32> to vector<16x256xbf16>
      %c0_27 = arith.constant 0 : index
      %c0_28 = arith.constant 0 : index
      %59 = vector.load %arg5[%c0_27, %c0_28] : memref<256x512xbf16, #tpu.memory_space<vmem>>, vector<256x512xbf16>
      %cst_29 = arith.constant dense<0.000000e+00> : vector<16x512xf32>
      %60 = tpu.matmul %58, %59, %cst_29 {dimension_numbers = #tpu.dot_dimension_numbers<[1], [0], [0], [1], [0, 0, 1, 1], [], []>} : vector<16x256xbf16>, vector<256x512xbf16>, vector<16x512xf32> -> vector<16x512xf32>
      %c1_i32_30 = arith.constant 1 : i32
      %61 = arith.cmpi eq, %arg0, %c1_i32_30 : i32
      %62 = arith.extui %61 : i1 to i32
      %c0_i32_31 = arith.constant 0 : i32
      %63 = arith.cmpi ne, %62, %c0_i32_31 : i32
      scf.if %63 {
        %67 = vector.broadcast %17 : vector<16x1xf32> to vector<16x512xf32>
        %68 = arith.mulf %60, %67 : vector<16x512xf32>
        %c0_33 = arith.constant 0 : index
        %c0_34 = arith.constant 0 : index
        %69 = vector.load %arg11[%c0_33, %c0_34] : memref<1x512xf32, #tpu.memory_space<vmem>>, vector<1x512xf32>
        %cst_35 = arith.constant dense<0.000000e+00> : vector<512xf32>
        %70 = vector.multi_reduction <add>, %68, %cst_35 [0] : vector<16x512xf32> to vector<512xf32>
        %71 = vector.shape_cast %70 : vector<512xf32> to vector<1x512xf32>
        %72 = arith.addf %69, %71 : vector<1x512xf32>
        %c0_36 = arith.constant 0 : index
        %c0_37 = arith.constant 0 : index
        %73 = vector.load %arg11[%c0_36, %c0_37] : memref<1x512xf32, #tpu.memory_space<vmem>>, vector<1x512xf32>
        tpu.vector_store %arg11[%c0_36, %c0_37], %72 {strides = array<i32>} : memref<1x512xf32, #tpu.memory_space<vmem>>, vector<1x512xf32>,
        %c0_38 = arith.constant 0 : index
        %c0_39 = arith.constant 0 : index
        %74 = vector.load %arg12[%c0_38, %c0_39] : memref<1x512xf32, #tpu.memory_space<vmem>>, vector<1x512xf32>
        %75 = arith.mulf %68, %68 : vector<16x512xf32>
        %cst_40 = arith.constant dense<0.000000e+00> : vector<512xf32>
        %76 = vector.multi_reduction <add>, %75, %cst_40 [0] : vector<16x512xf32> to vector<512xf32>
        %77 = vector.shape_cast %76 : vector<512xf32> to vector<1x512xf32>
        %78 = arith.addf %74, %77 : vector<1x512xf32>
        %c0_41 = arith.constant 0 : index
        %c0_42 = arith.constant 0 : index
        %79 = vector.load %arg12[%c0_41, %c0_42] : memref<1x512xf32, #tpu.memory_space<vmem>>, vector<1x512xf32>
        tpu.vector_store %arg12[%c0_41, %c0_42], %78 {strides = array<i32>} : memref<1x512xf32, #tpu.memory_space<vmem>>, vector<1x512xf32>,
      } else {
      }
      %c2_i32 = arith.constant 2 : i32
      %64 = arith.cmpi eq, %arg0, %c2_i32 : i32
      %65 = arith.extui %64 : i1 to i32
      %c0_i32_32 = arith.constant 0 : i32
      %66 = arith.cmpi ne, %65, %c0_i32_32 : i32
      scf.if %66 {
        %c0_33 = arith.constant 0 : index
        %c512 = arith.constant 512 : index
        %67 = vector.load %arg7[%c0_33, %c512] : memref<1x1664xf32, #tpu.memory_space<vmem>>, vector<1x512xf32>
        %c0_34 = arith.constant 0 : index
        %c1024 = arith.constant 1024 : index
        %68 = vector.load %arg7[%c0_34, %c1024] : memref<1x1664xf32, #tpu.memory_space<vmem>>, vector<1x512xf32>
        %c0_35 = arith.constant 0 : index
        %c0_36 = arith.constant 0 : index
        %69 = vector.load %arg11[%c0_35, %c0_36] : memref<1x512xf32, #tpu.memory_space<vmem>>, vector<1x512xf32>
        %cst_37 = arith.constant 2.500000e-02 : f32
        %70 = vector.broadcast %cst_37 : f32 to vector<1x512xf32>
        %71 = arith.mulf %69, %70 : vector<1x512xf32>
        %c0_38 = arith.constant 0 : index
        %c0_39 = arith.constant 0 : index
        %72 = vector.load %arg12[%c0_38, %c0_39] : memref<1x512xf32, #tpu.memory_space<vmem>>, vector<1x512xf32>
        %cst_40 = arith.constant 2.500000e-02 : f32
        %73 = vector.broadcast %cst_40 : f32 to vector<1x512xf32>
        %74 = arith.mulf %72, %73 : vector<1x512xf32>
        %75 = arith.mulf %71, %71 : vector<1x512xf32>
        %76 = arith.subf %74, %75 : vector<1x512xf32>
        %cst_41 = arith.constant 0.000000e+00 : f32
        %77 = vector.broadcast %cst_41 : f32 to vector<1x512xf32>
        %78 = arith.maximumf %76, %77 : vector<1x512xf32>
        %cst_42 = arith.constant 9.99999974E-6 : f32
        %79 = vector.broadcast %cst_42 : f32 to vector<1x512xf32>
        %80 = arith.addf %78, %79 : vector<1x512xf32>
        %81 = math.rsqrt %80 : vector<1x512xf32>
        %82 = arith.mulf %67, %81 : vector<1x512xf32>
        %83 = arith.mulf %71, %82 : vector<1x512xf32>
        %84 = arith.subf %68, %83 : vector<1x512xf32>
        %85 = vector.broadcast %82 : vector<1x512xf32> to vector<16x512xf32>
        %86 = arith.mulf %60, %85 : vector<16x512xf32>
        %87 = vector.broadcast %84 : vector<1x512xf32> to vector<16x512xf32>
        %88 = arith.addf %86, %87 : vector<16x512xf32>
        %cst_43 = arith.constant 2.000000e-01 : f32
        %89 = vector.broadcast %cst_43 : f32 to vector<16x512xf32>
        %90 = arith.mulf %89, %88 : vector<16x512xf32>
        %91 = arith.maximumf %88, %90 : vector<16x512xf32>
        %c0_44 = arith.constant 0 : index
        %c1536 = arith.constant 1536 : index
        %92 = vector.load %arg7[%c0_44, %c1536] : memref<1x1664xf32, #tpu.memory_space<vmem>>, vector<1x128xf32>
        %93 = arith.truncf %91 : vector<16x512xf32> to vector<16x512xbf16>
        %c0_45 = arith.constant 0 : index
        %c0_46 = arith.constant 0 : index
        %94 = vector.load %arg6[%c0_45, %c0_46] : memref<512x128xbf16, #tpu.memory_space<vmem>>, vector<512x128xbf16>
        %cst_47 = arith.constant dense<0.000000e+00> : vector<16x128xf32>
        %95 = tpu.matmul %93, %94, %cst_47 {dimension_numbers = #tpu.dot_dimension_numbers<[1], [0], [0], [1], [0, 0, 1, 1], [], []>} : vector<16x512xbf16>, vector<512x128xbf16>, vector<16x128xf32> -> vector<16x128xf32>
        %96 = vector.broadcast %92 : vector<1x128xf32> to vector<16x128xf32>
        %97 = arith.addf %95, %96 : vector<16x128xf32>
        %98 = math.tanh %97 : vector<16x128xf32>
        %c0_48 = arith.constant 0 : index
        %c0_49 = arith.constant 0 : index
        %99 = vector.load %arg8[%c0_48, %c0_49] : memref<16x128xf32, #tpu.memory_space<vmem>>, vector<16x128xf32>
        tpu.vector_store %arg8[%c0_48, %c0_49], %98 {strides = array<i32>} : memref<16x128xf32, #tpu.memory_space<vmem>>, vector<16x128xf32>,
      } else {
      }
    } else {
    }
    return
  }
  func.func @transform_0(%arg0: i32, %arg1: i32) -> (i32, i32) {
    %c0_i32 = arith.constant 0 : i32
    %c0_i32_0 = arith.constant 0 : i32
    return %arg1, %c0_i32 : i32, i32
  }
  func.func @transform_1(%arg0: i32, %arg1: i32) -> (i32, i32) {
    %c0_i32 = arith.constant 0 : i32
    %c0_i32_0 = arith.constant 0 : i32
    %c0_i32_1 = arith.constant 0 : i32
    return %c0_i32, %c0_i32_0 : i32, i32
  }
  func.func @transform_2(%arg0: i32, %arg1: i32) -> (i32, i32) {
    %c0_i32 = arith.constant 0 : i32
    %c0_i32_0 = arith.constant 0 : i32
    %c0_i32_1 = arith.constant 0 : i32
    return %c0_i32, %c0_i32_0 : i32, i32
  }
  func.func @transform_3(%arg0: i32, %arg1: i32) -> (i32, i32) {
    %c0_i32 = arith.constant 0 : i32
    %c0_i32_0 = arith.constant 0 : i32
    %c0_i32_1 = arith.constant 0 : i32
    return %c0_i32, %c0_i32_0 : i32, i32
  }
  func.func @transform_4(%arg0: i32, %arg1: i32) -> (i32, i32) {
    %c0_i32 = arith.constant 0 : i32
    %c0_i32_0 = arith.constant 0 : i32
    %c0_i32_1 = arith.constant 0 : i32
    return %c0_i32, %c0_i32_0 : i32, i32
  }
  func.func @transform_5(%arg0: i32, %arg1: i32) -> (i32, i32) {
    %c0_i32 = arith.constant 0 : i32
    %c0_i32_0 = arith.constant 0 : i32
    %c0_i32_1 = arith.constant 0 : i32
    return %c0_i32, %c0_i32_0 : i32, i32
  }
  func.func @transform_6(%arg0: i32, %arg1: i32) -> (i32, i32) {
    %c0_i32 = arith.constant 0 : i32
    %c0_i32_0 = arith.constant 0 : i32
    return %arg1, %c0_i32 : i32, i32
  }
}

</mosaic_0001>

<bundles_post_ra>
// kernel: tpu_custom_call.1
= control target key start
LH: loop header
LB: loop body
LE: loop exit
PB: predicated region body
PF: predicated region fallthrough
CT: control target
= control target key end

     0   :  { %s3347_s0 = inlined_call_operand.hbm [shape: bf16[48,128], index: 0, kind: input, shape index: {}]   ;;  %s3348_s1 = inlined_call_operand.hbm [shape: bf16[128,128], index: 1, kind: input, shape index: {}]   ;;  %s3349_s2 = inlined_call_operand.hbm [shape: bf16[128,256], index: 2, kind: input, shape index: {}]   ;;  %s3350_s3 = inlined_call_operand.hbm [shape: bf16[256,512], index: 3, kind: input, shape index: {}]   ;;  %s3351_s4 = inlined_call_operand.hbm [shape: bf16[512,128], index: 4, kind: input, shape index: {}]   ;;  %s3352_s5 = inlined_call_operand.hbm [shape: f32[1,1664], index: 5, kind: input, shape index: {}]   ;;  %s3353_s6 = inlined_call_operand.hbm [shape: f32[48,128], index: 6, kind: output, shape index: {}]  }
   0x1   :  { %3358 = sst [smem:[#allocation23_spill]] %s3348_s1 }
   0x2   :  { %3359 = sst [smem:[#allocation24_spill]] %s3349_s2 }
   0x3   :  { %3360 = sst [smem:[#allocation25_spill]] %s3350_s3 }
   0x4   :  { %3361 = sst [smem:[#allocation26_spill]] %s3351_s4 }
   0x5   :  { %3362 = sst [smem:[#allocation27_spill]] %s3352_s5 }
   0x6   :  { %3363 = sst [smem:[#allocation28_spill]] %s3353_s6 }
   0x7   :  { %11 = vsyncpa [#allocation7], 0 }
   0x8   :  { %13 = vsyncpa [#allocation7 + $0x1], 0 }
   0x9   :  { %14 = vsyncpa [#allocation10], 0 }
   0xa   :  { %15 = vsyncpa [#allocation13], 0 }
   0xb   :  { %16 = vsyncpa [#allocation16], 0 }
   0xc   :  { %17 = vsyncpa [#allocation8], 0 }
   0xd   :  { %19 = vsyncpa [#allocation8 + $0x1], 0  ;;  %s3019_s21 = smov 0   ;;  %s3021_s22 = smov 0  }
   0xe   :  { %s3023_s23 = smov 0   ;;  %s3025_s24 = smov 0  }
   0xf   :  { %s3027_s25 = smov 0   ;;  %s3029_s26 = smov 0  }
  0x10   :  { %s3031_s27 = smov 0   ;;  %s3033_s28 = smov 0  }
  0x11 LB: > { %s3354_s29 = sadd.s32 4294967295, %s2966_s28   ;;  %p1890_p0 = scmp.ge.s32.totalorder %s2966_s28, 1  ;;  %s2966_s28 = sphi %s3033_s28, %s25_s28   ;;  %s2962_s27 = sphi %s3031_s27, %s3388_s27   ;;  %s2958_s26 = sphi %s3029_s26, %s3387_s26   ;;  %s2954_s25 = sphi %s3027_s25, %s3386_s25   ;;  %s2950_s24 = sphi %s3025_s24, %s3385_s24   ;;  %s2946_s23 = sphi %s3023_s23, %s3384_s23   ;;  %s2942_s22 = sphi %s3021_s22, %s3383_s22   ;;  %s2938_s21 = sphi %s3019_s21, %s3382_s21  }
  0x12   : > { %p3063_p1 = scmp.eq.s32.totalorder %s3354_s29, 0  ;;  %p199_p2 = scmp.lt.s32.totalorder %s2966_s28, 10 }
  0x13   : > { %s3365_s1 = sld [smem:[#allocation23_spill]]  ;;  %s2968_s11 = smov [#allocation9]  }
  0x14   : > { %p3071_p3 = pnand %p1890_p0, %p199_p2  ;;  %s212_s12 = sshll.u32 %s2968_s11, 4  ;;  %s213_s12 = int_to_ptr.vmem [resolvable:$true] %s212_s12 }
  0x15   : > { %s3368_s3 = sld [smem:[#allocation25_spill]]  ;;  %s3356_s17 = smov 64  }
  0x16   : > { %p2551_p4 = pneg %p3071_p3  ;;  %s3357_s18 = smov 4  }
  0x17   : > { %s2971_s19 = smov [#allocation12]   ;;  %s2972_s7 = smov 256  }
  0x18   : > { %p3079_p5 = pnand %p2551_p4, %p3063_p1  ;;  %s240_s20 = sshll.u32 %s2971_s19, 4  ;;  %s241_s20 = int_to_ptr.vmem [resolvable:$true] %s240_s20 }
  0x19   : > { %s210_s9 = sshll.u32 %s3365_s1, 4  ;;  %s2973_s8 = smov 16   ;;  %s211_s9 = int_to_ptr.hbm [resolvable:$true] %s210_s9 }
  0x1a   : > { %2554 = dma.hbm_to_vmem [thread:$0]  (!%p3079_p5), %s211_s9, 1024, %s213_s12, [#allocation10], %s3356_s17, %s3356_s17, %s3357_s18  }
  0x1b   : > { %s238_s16 = sshll.u32 %s3368_s3, 4  ;;  %s3369_s2 = sld [smem:[#allocation24_spill]]  ;;  %s239_s16 = int_to_ptr.hbm [resolvable:$true] %s238_s16 }
  0x1c   : > { %2560 = dma.hbm_to_vmem [thread:$0]  (!%p3079_p5), %s239_s16, 8192, %s241_s20, [#allocation13], %s2972_s7, %s2972_s7, %s2973_s8  }
  0x1d   : > { %s2974_s29 = smov [#allocation11]   ;;  %s3370_s4 = sld [smem:[#allocation26_spill]] }
  0x1e   : > { %s226_s1 = sshll.u32 %s2974_s29, 4  ;;  %s2975_s12 = smov 128   ;;  %s227_s1 = int_to_ptr.vmem [resolvable:$true] %s226_s1 }
  0x1f   : > { %s2976_s19 = smov 8   ;;  %s2977_s16 = smov [#allocation14]  }
  0x20   : > { %s254_s29 = sshll.u32 %s2977_s16, 4  ;;  %s3371_s5 = sld [smem:[#allocation27_spill]]  ;;  %s255_s29 = int_to_ptr.vmem [resolvable:$true] %s254_s29 }
  0x21   : > { %s224_s15 = sshll.u32 %s3369_s2, 4  ;;  %s1889_s6 = sadd.s32 4294967294, %s2966_s28   ;;  %s225_s15 = int_to_ptr.hbm [resolvable:$true] %s224_s15 }
  0x22   : > { %2557 = dma.hbm_to_vmem [thread:$0]  (!%p3079_p5), %s225_s15, 2048, %s227_s1, [#allocation10], %s2975_s12, %s2975_s12, %s2976_s19  }
  0x23   : > { %s252_s9 = sshll.u32 %s3370_s4, 4  ;;  %s2978_s1 = smov [#allocation15]   ;;  %s253_s9 = int_to_ptr.hbm [resolvable:$true] %s252_s9 }
  0x24   : > { %2563 = dma.hbm_to_vmem [thread:$0]  (!%p3079_p5), %s253_s9, 4096, %s255_s29, [#allocation13], %s3356_s17, %s3356_s17, %s3357_s18  }
  0x25   : > { %s269_s3 = sshll.u32 %s2978_s1, 4  ;;  %s34_s11 = sadd.s32 1, %s2958_s26  ;;  %s270_s3 = int_to_ptr.vmem [resolvable:$true] %s269_s3 }
  0x26   : > { %s267_s8 = sshll.u32 %s3371_s5, 4  ;;  %s37_s14 = sadd.s32 1, %s2962_s27  ;;  %s268_s8 = int_to_ptr.hbm [resolvable:$true] %s267_s8 }
  0x27   : > { %2566 = dma.hbm_to_vmem [thread:$0]  (!%p3079_p5), %s268_s8, 208, %s270_s3, [#allocation16]  }
  0x28   : > { %p35_p6 = scmp.ge.s32.totalorder %s34_s11, 3  ;;  %s44_s15 = sadd.s32 1, %s2946_s23 }
  0x29   : > { %p51_p7 = scmp.ne.s32.totalorder %s2946_s23, %s2942_s22  ;;  %p52_p8 = scmp.eq.s32.totalorder %s2966_s28, 0 }
  0x2a   : > { %s3390_s11 = smov (%p35_p6, %s34_s11), 0  ;;  %s3392_s14 = smov (!%p35_p6, %s37_s14), %s2962_s27 }
  0x2b   : > { %s41_s13 = ssub.s32 %s2958_s26, %s3390_s11  ;;  %p3126_p9 = por %p52_p8, %p51_p7 }
  0x2c   : > { %p39_p10 = scmp.ge.s32.totalorder %s3392_s14, 3  ;;  %p42_p11 = scmp.eq.s32.totalorder %s41_s13, 0 }
  0x2d   : > { %p57_p12 = scmp.ne.s32.totalorder %s2942_s22, %s2938_s21  ;;  %s3373_s12 = sadd.s32 4294967295, %s2966_s28  }
  0x2e   : > { %p186_p13 = scmp.eq.s32.totalorder %s3373_s12, 8  ;;  %s3394_s14 = smov (%p39_p10, %s3392_s14), 0 }
  0x2f   : > { %s3137_s19 = scalar_select %p42_p11, %s2946_s23, %s44_s15  }
  0x30   : > { %p3141_p0 = por %p3063_p1, %p57_p12  ;;  %p3148_p2 = por %p186_p13, %p51_p7 }
  0x31   : > { %p192_p4 = scmp.eq.s32.totalorder %s1889_s6, 8  ;;  %p2580_p5 = scmp.lt.s32.totalorder %s2966_s28, 9 }
  0x32   : > { %s280_s20 = sand.u32 1, %s2946_s23   ;;  %s2404_s7 = sshll.u32 %s2958_s26, 3 }
  0x33   : > { %p3155_p6 = por %p192_p4, %p57_p12  ;;  %s1897_s1 = sshll.u32 %s280_s20, 3 }
  0x34   : > { %s289_s13 = scalar_lea.hbm %s3347_s0, %s2404_s7  ;;  %s284_s17 = scalar_lea.vmem [#allocation6], %s1897_s1 }
  0x35   : > { %s290_s12 = sshll.u32 %s289_s13, 4  ;;  %s292_s18 = sshll.u32 %s284_s17, 4  ;;  %s291_s12 = int_to_ptr.hbm [resolvable:$true] %s290_s12  ;;  %s293_s18 = int_to_ptr.vmem [resolvable:$true] %s292_s18 }
  0x36   : > { %p2568_p7 = pnand %p2580_p5, %p3126_p9  ;;  %s281_s6 = scalar_lea.sflag [#allocation7], %s280_s20 }
  0x37   : > { %s3377_s2 = smov 4   ;;  %s3378_s4 = smov 64  }
  0x38   : > { %2570 = dma.hbm_to_vmem [thread:$0]  (!%p2568_p7), %s291_s12, 128, %s293_s18, %s281_s6, %s3378_s4, %s3378_s4, %s3377_s2  }
  0x39   : > { %304 = sbr.rel (%p3071_p3) target bundleno = 930 (0x3a2), region = 44  ;;  %s3170_s5 = sand.u32 (!%p3071_p3), 1, %s2942_s22  }
  0x3a   : > { %s1901_s7 = sshll.u32 (!%p3071_p3), %s3170_s5, 3  ;;  %s307_s1 = scalar_lea.sflag (!%p3071_p3), [#allocation7], %s3170_s5 }
  0x3b   : > { %s3174_s17 = scalar_lea.vmem (!%p3071_p3), [#allocation6], %s1901_s7 }
  0x3e   : > { %2917 = dma.done.wait (%p3141_p0), %s307_s1, 128  }
  0x3f   : > { %2919 = vsyncadd (%p3141_p0), %s307_s1, 4294967168 }
  0x40   : > { %2921 = dma.done.wait (%p3063_p1), [#allocation10], 3072  }
  0x41   : > { %2923 = vsyncadd (%p3063_p1), [#allocation10], 4294964224 }
  0x42   : > { %2925 = dma.done.wait (%p3063_p1), [#allocation13], 12288  }
  0x43   : > { %2927 = vsyncadd (%p3063_p1), [#allocation13], 4294955008 }
  0x44   : > { %2929 = dma.done.wait (%p3063_p1), [#allocation16], 208  }
  0x45   : > { %2931 = vsyncadd (%p3063_p1), [#allocation16], 4294967088  ;;  %s1907_s2 = sshll.u32 %s3170_s5, 4  ;;  %p367_p3 = scmp.eq.s32.totalorder %s2954_s25, 0 }
  0x46   : > { %p368_p8 = scmp.eq.s32.totalorder %s2950_s24, 0  ;;  %s3195_s4 = scalar_lea.vmem [#allocation17], %s1907_s2 }
  0x48   : > { %p369_p9 = pnand %p368_p8, %p367_p3 }
  0x4a   : > { %372 = sbr.rel (%p369_p9) target bundleno = 84 (0x54), region = 72 }
  0x4f   : > { %v373_v0 = vlaneseq  ;;  %v2979_v1 = vmov 0.0  }
  0x51   : > { %vm375_vm0 = vcmp.lt.s32.totalorder %v373_v0, 256 }
  0x52   : > { %377 = vst.msk [vmem:[#allocation2] sm:$0x3] %vm375_vm0, %v2979_v1 }
  0x53   : > { %378 = vst.msk [vmem:[#allocation3] sm:$0x3] %vm375_vm0, %v2979_v1 }
  0x54 PF: > { %p379_p10 = scmp.eq.s32.totalorder %s2954_s25, 1 }
  0x56   : > { %p380_p11 = pnand %p379_p10, %p368_p8 }
  0x58   : > { %383 = sbr.rel (%p380_p11) target bundleno = 98 (0x62), region = 76 }
  0x5d   : > { %v384_v2 = vlaneseq  ;;  %v2980_v3 = vmov 0.0  }
  0x5f   : > { %vm386_vm1 = vcmp.lt.s32.totalorder %v384_v2, 512 }
  0x60   : > { %388 = vst.msk [vmem:[#allocation4] sm:$0xf] %vm386_vm1, %v2980_v3 }
  0x61   : > { %389 = vst.msk [vmem:[#allocation5] sm:$0xf] %vm386_vm1, %v2980_v3 }
  0x62 PF: > { %v390_v4 = vlaneseq  ;;  %s1908_s30 = sshll.u32 %s2950_s24, 4  ;;  %v2413_v5 = vld [vmem:[#allocation9 + $0x38] sm:$0xff]  ;;  %v2412_v8 = vld [vmem:[#allocation9 + $0x30] sm:$0xff]  ;;  %v1997_v16 = vld [vmem:[#allocation11 + $0x60] sm:$0xf]  ;;  %v2981_v24 = vmov 0.0  }
  0x63   : > { %v394_v6 = vstv %s1908_s30  ;;  %475 = vmatpush.bf16.msra.mxu0 %v2413_v5  ;;  %v2005_v9 = vld [vmem:[#allocation11 + $0x70] sm:$0xf]  ;;  %v2429_v10 = vld [vmem:[#allocation11 + $0x74] sm:$0xf0]  ;;  %v2428_v11 = vld [vmem:[#allocation11 + $0x74] sm:$0xf] }
  0x64   : > { %v391_v7 = vshrl.u32 %v390_v4, 7  ;;  %v2006_v14 = vor.u32 %v2429_v10, %v2005_v9  ;;  %v2007_v15 = vld [vmem:[#allocation11 + $0x78] sm:$0xf0]  ;;  %v2427_v18 = vld [vmem:[#allocation11 + $0x64] sm:$0xf0]  ;;  %v2410_v32 = vld [vmem:[#allocation9 + $0x20] sm:$0xff] }
  0x65   : > { %v2010_v17 = vor.u32 %v2428_v11, %v2007_v15  ;;  %v2426_v19 = vld [vmem:[#allocation11 + $0x64] sm:$0xf]  ;;  %v1999_v20 = vld [vmem:[#allocation11 + $0x68] sm:$0xf0]  ;;  %v1998_v23 = vor.u32 %v2427_v18, %v1997_v16  ;;  %v1989_v27 = vld [vmem:[#allocation11 + $0x50] sm:$0xf] }
  0x66   : > { %v392_v12 = vadd.s32 8, %v391_v7  ;;  %v395_v13 = vadd.s32 %v394_v6, %v391_v7  ;;  %v2411_v22 = vld [vmem:[#allocation9 + $0x28] sm:$0xff]  ;;  %590 = vmatpush.bf16.msra.mxu1 %v2006_v14  ;;  %v2002_v26 = vor.u32 %v2426_v19, %v1999_v20  ;;  %v2425_v28 = vld [vmem:[#allocation11 + $0x54] sm:$0xf0]  ;;  %v2424_v29 = vld [vmem:[#allocation11 + $0x54] sm:$0xf] }
  0x67   : > { %476 = vmatpush.bf16.msra.mxu0 %v2412_v8  ;;  %604 = vmatpush.bf16.msra.mxu2 %v2010_v17  ;;  %v1991_v30 = vld [vmem:[#allocation11 + $0x58] sm:$0xf0]  ;;  %v1990_v33 = vor.u32 %v2425_v28, %v1989_v27  ;;  %v1981_v35 = vld [vmem:[#allocation11 + $0x40] sm:$0xf]  ;;  %v2423_v36 = vld [vmem:[#allocation11 + $0x44] sm:$0xf0] }
  0x68   : > { %v396_v21 = vadd.s32 %v394_v6, %v392_v12  ;;  %vm397_vm2 = vcmp.lt.s32.totalorder %v395_v13, 40  ;;  %v1994_v34 = vor.u32 %v2424_v29, %v1991_v30  ;;  %v2422_v37 = vld [vmem:[#allocation11 + $0x44] sm:$0xf]  ;;  %v1983_v38 = vld [vmem:[#allocation11 + $0x48] sm:$0xf0]  ;;  %v2409_v39 = vld [vmem:[#allocation9 + $0x18] sm:$0xff]  ;;  %v1982_v40 = vor.u32 %v2423_v36, %v1981_v35 }
  0x69   : > { %v3202_v25 = vsel %vm397_vm2, 1.0, %v2981_v24  ;;  %v1986_v41 = vor.u32 %v2422_v37, %v1983_v38  ;;  %v2408_v42 = vld [vmem:[#allocation9 + $0x10] sm:$0xff]  ;;  %v2407_v43 = vld [vmem:[#allocation9 + $0x8] sm:$0xff]  ;;  %v2406_v44 = vld [vmem:[#allocation9] sm:$0xff]  ;;  %p2011_p1 = scmp.ne.s32.totalorder %s2954_s25, 0 }
  0x6a   : > { %vm398_vm3 = vcmp.lt.s32.totalorder %v396_v21, 40  ;;  %591 = vmatpush.bf16.msra.mxu1 %v1998_v23  ;;  %v2405_v45 = vld [vmem:[%s3174_s17] sm:$0xff]  ;;  %v1965_v52 = vld [vmem:[#allocation11 + $0x20] sm:$0xf]  ;;  %v2419_v53 = vld [vmem:[#allocation11 + $0x24] sm:$0xf0] }
  0x6b   : > { %v3204_v31 = vsel %vm398_vm3, 1.0, %v2981_v24  ;;  %477 = vmatpush.bf16.msra.mxu0 %v2411_v22  ;;  %605 = vmatpush.bf16.msra.mxu2 %v2002_v26  ;;  %v1973_v46 = vld [vmem:[#allocation11 + $0x30] sm:$0xf]  ;;  %v2421_v47 = vld [vmem:[#allocation11 + $0x34] sm:$0xf0]  ;;  %v1966_v55 = vor.u32 %v2419_v53, %v1965_v52 }
  0x6c   : > { %v2420_v48 = vld [vmem:[#allocation11 + $0x34] sm:$0xf]  ;;  %v1974_v49 = vor.u32 %v2421_v47, %v1973_v46  ;;  %v1975_v50 = vld [vmem:[#allocation11 + $0x38] sm:$0xf0]  ;;  %v2418_v54 = vld [vmem:[#allocation11 + $0x24] sm:$0xf] }
  0x6d   : > { %v1978_v51 = vor.u32 %v2420_v48, %v1975_v50  ;;  %v1967_v56 = vld [vmem:[#allocation11 + $0x28] sm:$0xf0]  ;;  %v1957_v58 = vld [vmem:[#allocation11 + $0x10] sm:$0xf]  ;;  %v2417_v59 = vld [vmem:[#allocation11 + $0x14] sm:$0xf0] }
  0x6e   : > { %592 = vmatpush.bf16.msra.mxu1 %v1990_v33  ;;  %v1970_v57 = vor.u32 %v2418_v54, %v1967_v56  ;;  %v2416_v60 = vld [vmem:[#allocation11 + $0x14] sm:$0xf]  ;;  %v1958_v61 = vor.u32 %v2417_v59, %v1957_v58  ;;  %v1959_v62 = vld [vmem:[#allocation11 + $0x18] sm:$0xf0]  ;;  %v1949_v0 = vld [vmem:[#allocation11] sm:$0xf] }
  0x6f   : > { %478 = vmatpush.bf16.msra.mxu0 %v2410_v32  ;;  %606 = vmatpush.bf16.msra.mxu2 %v1994_v34  ;;  %v1962_v63 = vor.u32 %v2416_v60, %v1959_v62  ;;  %v2415_v1 = vld [vmem:[#allocation11 + $0x4] sm:$0xf0]  ;;  %v2414_v2 = vld [vmem:[#allocation11 + $0x4] sm:$0xf]  ;;  %v1951_v5 = vld [vmem:[#allocation11 + $0x8] sm:$0xf0] }
  0x70   : > { %v1950_v3 = vor.u32 %v2415_v1, %v1949_v0  ;;  %v1954_v6 = vor.u32 %v2414_v2, %v1951_v5 }
  0x72   : > { %593 = vmatpush.bf16.msra.mxu1 %v1982_v40 }
  0x73   : > { %479 = vmatpush.bf16.msra.mxu0 %v2409_v39  ;;  %607 = vmatpush.bf16.msra.mxu2 %v1986_v41 }
  0x76   : > { %594 = vmatpush.bf16.msra.mxu1 %v1974_v49 }
  0x77   : > { %480 = vmatpush.bf16.msra.mxu0 %v2408_v42  ;;  %608 = vmatpush.bf16.msra.mxu2 %v1978_v51 }
  0x7a   : > { %595 = vmatpush.bf16.msra.mxu1 %v1966_v55 }
  0x7b   : > { %481 = vmatpush.bf16.msra.mxu0 %v2407_v43  ;;  %609 = vmatpush.bf16.msra.mxu2 %v1970_v57 }
  0x7e   : > { %596 = vmatpush.bf16.msra.mxu1 %v1958_v61 }
  0x7f   : > { %482 = vmatpush.bf16.msra.mxu0 %v2406_v44  ;;  %610 = vmatpush.bf16.msra.mxu2 %v1962_v63 }
  0x82   : > { %483 = vmatmul.bf16.vlgmr.msra.gmra.mxu0 %v2405_v45  ;;  %597 = vmatpush.bf16.msra.mxu1 %v1950_v3 }
  0x83   : > { %611 = vmatpush.bf16.msra.mxu2 %v1954_v6 }
  0xff   : > { %v484_v7 = vpop.f32.mrf.mxu0 }
 0x100   : > { %v489_v8 = vmul.f32 0.2, %v484_v7 }
 0x102   : > { %v491_v11 = vmax.f32 %v484_v7, %v489_v8 }
 0x107   : > { %v486_v9 = vpop.f32.mrf.mxu0 }
 0x108   : > { %v490_v10 = vmul.f32 0.2, %v486_v9 }
 0x10a   : > { %v492_v12 = vmax.f32 %v486_v9, %v490_v10 }
 0x10c   : > { %v493_v13 = vpack.c.bf16 %v492_v12, %v491_v11 }
 0x10e   : > { %598 = vmatmul.bf16.vlgmr.msra.gmra.mxu1 %v493_v13  ;;  %612 = vmatmul.bf16.vlgmr.msra.gmra.mxu2 %v493_v13 }
 0x18b   : > { %v3207_v14 = vpop.f32.mrf.mxu1 }
 0x191   : > { %v3209_v15 = vpop.f32.mrf.mxu2 }
 0x193   : > { %v3211_v16 = vpop.f32.mrf.mxu1 }
 0x195   : > { %620 = sbr.rel (%p2011_p1) target bundleno = 435 (0x1b3), region = 80 }
 0x199   : > { %v3213_v17 = vpop.f32.mrf.mxu2 }
 0x19a   : > { %v621_v18 = vmul.f32 %v3202_v25, %v3207_v14  ;;  %v622_v19 = vmul.f32 %v3202_v25, %v3209_v15  ;;  %v623_v20 = vmul.f32 %v3204_v31, %v3211_v16  ;;  %v624_v21 = vmul.f32 %v3204_v31, %v3213_v17  ;;  %v625_v54 = vld [vmem:[#allocation2] sm:$0x3]  ;;  %v652_v60 = vld [vmem:[#allocation3] sm:$0x3] }
 0x19b   : > { %vm643_vm4 = vcmask 1040384   ;;  %vm649_vm5 = vcmp.lt.s32.totalorder %v390_v4, 256 }
 0x19c   : > { %v626_v22 = vadd.f32 %v623_v20, %v621_v18  ;;  %v633_v23 = vadd.f32 %v624_v21, %v622_v19  ;;  %v653_v24 = vmul.f32 %v621_v18, %v621_v18  ;;  %v654_v26 = vmul.f32 %v622_v19, %v622_v19 }
 0x19d   : > { %v655_v27 = vmul.f32 %v623_v20, %v623_v20  ;;  %v656_v28 = vmul.f32 %v624_v21, %v624_v21 }
 0x19e   : > { %v627_v29 = vrot.slane %v626_v22, 4  ;;  %v634_v30 = vrot.slane %v633_v23, 4 }
 0x19f   : > { %v657_v32 = vadd.f32 %v655_v27, %v653_v24  ;;  %v664_v33 = vadd.f32 %v656_v28, %v654_v26 }
 0x1a0   : > { %v628_v34 = vadd.f32 %v627_v29, %v626_v22  ;;  %v635_v35 = vadd.f32 %v634_v30, %v633_v23 }
 0x1a1   : > { %v658_v36 = vrot.slane %v657_v32, 4  ;;  %v665_v37 = vrot.slane %v664_v33, 4 }
 0x1a2   : > { %v629_v38 = vrot.slane %v628_v34, 2  ;;  %v636_v39 = vrot.slane %v635_v35, 2 }
 0x1a3   : > { %v659_v40 = vadd.f32 %v658_v36, %v657_v32  ;;  %v666_v41 = vadd.f32 %v665_v37, %v664_v33 }
 0x1a4   : > { %v630_v42 = vadd.f32 %v629_v38, %v628_v34  ;;  %v637_v43 = vadd.f32 %v636_v39, %v635_v35 }
 0x1a5   : > { %v660_v44 = vrot.slane %v659_v40, 2  ;;  %v667_v45 = vrot.slane %v666_v41, 2 }
 0x1a6   : > { %v631_v46 = vrot.slane %v630_v42, 1  ;;  %v638_v47 = vrot.slane %v637_v43, 1 }
 0x1a7   : > { %v661_v48 = vadd.f32 %v660_v44, %v659_v40  ;;  %v668_v49 = vadd.f32 %v667_v45, %v666_v41 }
 0x1a8   : > { %v632_v50 = vadd.f32 %v631_v46, %v630_v42  ;;  %v639_v51 = vadd.f32 %v638_v47, %v637_v43 }
 0x1a9   : > { %v662_v52 = vrot.slane %v661_v48, 1  ;;  %v669_v53 = vrot.slane %v668_v49, 1 }
 0x1aa   : > { %v642_v55 = vrot.slane %v639_v51, 7 }
 0x1ab   : > { %v663_v56 = vadd.f32 %v662_v52, %v661_v48  ;;  %v670_v57 = vadd.f32 %v669_v53, %v668_v49 }
 0x1ac   : > { %v644_v58 = vsel %vm643_vm4, %v632_v50, %v642_v55 }
 0x1ad   : > { %v646_v59 = vadd.f32 %v644_v58, %v625_v54  ;;  %v673_v61 = vrot.slane %v670_v57, 7 }
 0x1af   : > { %651 = vst.msk [vmem:[#allocation2] sm:$0x3] %vm649_vm5, %v646_v59  ;;  %v674_v62 = vsel %vm643_vm4, %v663_v56, %v673_v61 }
 0x1b0   : > { %v676_v63 = vadd.f32 %v674_v62, %v652_v60 }
 0x1b2   : > { %677 = vst.msk [vmem:[#allocation3] sm:$0x3] %vm649_vm5, %v676_v63 }
 0x1b3 PF: > { %p2012_p12 = scmp.le.s32.totalorder %s2954_s25, 0 }
 0x1b4   : > { %p2269_p13 = scmp.ne.s32.totalorder (!%p2012_p12), %s2954_s25, 1 }
 0x1b5   : > { %681 = sbr.rel (%p2012_p12) target bundleno = 909 (0x38d), region = 84 }
 0x1ba   : > { %v2127_v0 = vld [vmem:[#allocation12 + $0xe0] sm:$0xf]  ;;  %v2460_v1 = vld [vmem:[#allocation12 + $0xec] sm:$0xf0]  ;;  %v2458_v6 = vld [vmem:[#allocation12 + $0xe4] sm:$0xf] }
 0x1bb   : > { %v2255_v2 = vld [vmem:[#allocation12 + $0x1e0] sm:$0xf]  ;;  %v2128_v3 = vor.u32 %v2460_v1, %v2127_v0  ;;  %v2492_v5 = vld [vmem:[#allocation12 + $0x1ec] sm:$0xf0]  ;;  %v2129_v7 = vld [vmem:[#allocation12 + $0xf0] sm:$0xf0] }
 0x1bc   : > { %v2256_v8 = vor.u32 %v2492_v5, %v2255_v2  ;;  %v2132_v9 = vor.u32 %v2458_v6, %v2129_v7  ;;  %v2490_v10 = vld [vmem:[#allocation12 + $0x1e4] sm:$0xf]  ;;  %v2257_v11 = vld [vmem:[#allocation12 + $0x1f0] sm:$0xf0]  ;;  %v2111_v12 = vld [vmem:[#allocation12 + $0xc0] sm:$0xf] }
 0x1bd   : > { %1117 = vmatpush.bf16.msra.mxu0 %v2128_v3  ;;  %v2260_v13 = vor.u32 %v2490_v10, %v2257_v11  ;;  %v2456_v18 = vld [vmem:[#allocation12 + $0xcc] sm:$0xf0]  ;;  %v2239_v19 = vld [vmem:[#allocation12 + $0x1c0] sm:$0xf]  ;;  %v2454_v23 = vld [vmem:[#allocation12 + $0xc4] sm:$0xf] }
 0x1be   : > { %v2488_v20 = vld [vmem:[#allocation12 + $0x1cc] sm:$0xf0]  ;;  %1131 = vmatpush.bf16.msra.mxu1 %v2256_v8  ;;  %1145 = vmatpush.bf16.msra.mxu2 %v2132_v9  ;;  %v2112_v21 = vor.u32 %v2456_v18, %v2111_v12  ;;  %v2113_v24 = vld [vmem:[#allocation12 + $0xd0] sm:$0xf0]  ;;  %v2486_v26 = vld [vmem:[#allocation12 + $0x1c4] sm:$0xf] }
 0x1bf   : > { %v2240_v22 = vor.u32 %v2488_v20, %v2239_v19  ;;  %1159 = vmatpush.bf16.msra.mxu3 %v2260_v13  ;;  %v2116_v27 = vor.u32 %v2454_v23, %v2113_v24  ;;  %v2241_v28 = vld [vmem:[#allocation12 + $0x1d0] sm:$0xf0]  ;;  %v2095_v29 = vld [vmem:[#allocation12 + $0xa0] sm:$0xf]  ;;  %v2452_v30 = vld [vmem:[#allocation12 + $0xac] sm:$0xf0] }
 0x1c0   : > { %v2244_v32 = vor.u32 %v2486_v26, %v2241_v28  ;;  %v2223_v33 = vld [vmem:[#allocation12 + $0x1a0] sm:$0xf]  ;;  %v2484_v34 = vld [vmem:[#allocation12 + $0x1ac] sm:$0xf0]  ;;  %v2450_v35 = vld [vmem:[#allocation12 + $0xa4] sm:$0xf]  ;;  %v2096_v36 = vor.u32 %v2452_v30, %v2095_v29 }
 0x1c1   : > { %1118 = vmatpush.bf16.msra.mxu0 %v2112_v21  ;;  %v2097_v37 = vld [vmem:[#allocation12 + $0xb0] sm:$0xf0]  ;;  %v2482_v38 = vld [vmem:[#allocation12 + $0x1a4] sm:$0xf]  ;;  %v2224_v40 = vor.u32 %v2484_v34, %v2223_v33  ;;  %v2079_v42 = vld [vmem:[#allocation12 + $0x80] sm:$0xf] }
 0x1c2   : > { %v2225_v39 = vld [vmem:[#allocation12 + $0x1b0] sm:$0xf0]  ;;  %1132 = vmatpush.bf16.msra.mxu1 %v2240_v22  ;;  %1146 = vmatpush.bf16.msra.mxu2 %v2116_v27  ;;  %v2100_v41 = vor.u32 %v2450_v35, %v2097_v37  ;;  %v2448_v43 = vld [vmem:[#allocation12 + $0x8c] sm:$0xf0]  ;;  %v2207_v44 = vld [vmem:[#allocation12 + $0x180] sm:$0xf] }
 0x1c3   : > { %1160 = vmatpush.bf16.msra.mxu3 %v2244_v32  ;;  %v2228_v45 = vor.u32 %v2482_v38, %v2225_v39  ;;  %v2480_v46 = vld [vmem:[#allocation12 + $0x18c] sm:$0xf0]  ;;  %v2446_v47 = vld [vmem:[#allocation12 + $0x84] sm:$0xf]  ;;  %v2081_v48 = vld [vmem:[#allocation12 + $0x90] sm:$0xf0]  ;;  %v2080_v51 = vor.u32 %v2448_v43, %v2079_v42 }
 0x1c4   : > { %v2478_v49 = vld [vmem:[#allocation12 + $0x184] sm:$0xf]  ;;  %v2209_v50 = vld [vmem:[#allocation12 + $0x190] sm:$0xf0]  ;;  %v2208_v52 = vor.u32 %v2480_v46, %v2207_v44  ;;  %v2084_v53 = vor.u32 %v2446_v47, %v2081_v48  ;;  %v2063_v54 = vld [vmem:[#allocation12 + $0x60] sm:$0xf] }
 0x1c5   : > { %1119 = vmatpush.bf16.msra.mxu0 %v2096_v36  ;;  %v2444_v55 = vld [vmem:[#allocation12 + $0x6c] sm:$0xf0]  ;;  %v2191_v56 = vld [vmem:[#allocation12 + $0x160] sm:$0xf]  ;;  %v2212_v57 = vor.u32 %v2478_v49, %v2209_v50  ;;  %v2442_v59 = vld [vmem:[#allocation12 + $0x64] sm:$0xf] }
 0x1c6   : > { %1133 = vmatpush.bf16.msra.mxu1 %v2224_v40  ;;  %1147 = vmatpush.bf16.msra.mxu2 %v2100_v41  ;;  %v2476_v58 = vld [vmem:[#allocation12 + $0x16c] sm:$0xf0]  ;;  %v2065_v60 = vld [vmem:[#allocation12 + $0x70] sm:$0xf0]  ;;  %v2474_v61 = vld [vmem:[#allocation12 + $0x164] sm:$0xf]  ;;  %v2064_v63 = vor.u32 %v2444_v55, %v2063_v54 }
 0x1c7   : > { %1161 = vmatpush.bf16.msra.mxu3 %v2228_v45  ;;  %v2193_v62 = vld [vmem:[#allocation12 + $0x170] sm:$0xf0]  ;;  %v2192_v0 = vor.u32 %v2476_v58, %v2191_v56  ;;  %v2068_v1 = vor.u32 %v2442_v59, %v2065_v60  ;;  %v2047_v2 = vld [vmem:[#allocation12 + $0x40] sm:$0xf]  ;;  %v2440_v3 = vld [vmem:[#allocation12 + $0x4c] sm:$0xf0] }
 0x1c8   : > { %v2175_v5 = vld [vmem:[#allocation12 + $0x140] sm:$0xf]  ;;  %v2196_v6 = vor.u32 %v2474_v61, %v2193_v62  ;;  %v2472_v7 = vld [vmem:[#allocation12 + $0x14c] sm:$0xf0]  ;;  %v2438_v8 = vld [vmem:[#allocation12 + $0x44] sm:$0xf]  ;;  %v2048_v12 = vor.u32 %v2440_v3, %v2047_v2 }
 0x1c9   : > { %1120 = vmatpush.bf16.msra.mxu0 %v2080_v51  ;;  %v2049_v9 = vld [vmem:[#allocation12 + $0x50] sm:$0xf0]  ;;  %v2470_v10 = vld [vmem:[#allocation12 + $0x144] sm:$0xf]  ;;  %v2176_v13 = vor.u32 %v2472_v7, %v2175_v5  ;;  %v2031_v19 = vld [vmem:[#allocation12 + $0x20] sm:$0xf] }
 0x1ca   : > { %1134 = vmatpush.bf16.msra.mxu1 %v2208_v52  ;;  %1148 = vmatpush.bf16.msra.mxu2 %v2084_v53  ;;  %v2177_v11 = vld [vmem:[#allocation12 + $0x150] sm:$0xf0]  ;;  %v2052_v18 = vor.u32 %v2438_v8, %v2049_v9  ;;  %v2436_v20 = vld [vmem:[#allocation12 + $0x2c] sm:$0xf0]  ;;  %v2159_v21 = vld [vmem:[#allocation12 + $0x120] sm:$0xf] }
 0x1cb   : > { %1162 = vmatpush.bf16.msra.mxu3 %v2212_v57  ;;  %v2180_v22 = vor.u32 %v2470_v10, %v2177_v11  ;;  %v2468_v23 = vld [vmem:[#allocation12 + $0x12c] sm:$0xf0]  ;;  %v2434_v24 = vld [vmem:[#allocation12 + $0x24] sm:$0xf]  ;;  %v2033_v26 = vld [vmem:[#allocation12 + $0x30] sm:$0xf0]  ;;  %v2032_v29 = vor.u32 %v2436_v20, %v2031_v19 }
 0x1cc   : > { %v2466_v27 = vld [vmem:[#allocation12 + $0x124] sm:$0xf]  ;;  %v2161_v28 = vld [vmem:[#allocation12 + $0x130] sm:$0xf0]  ;;  %v2015_v30 = vld [vmem:[#allocation12] sm:$0xf]  ;;  %v2160_v33 = vor.u32 %v2468_v23, %v2159_v21  ;;  %v2036_v34 = vor.u32 %v2434_v24, %v2033_v26 }
 0x1cd   : > { %1121 = vmatpush.bf16.msra.mxu0 %v2064_v63  ;;  %v2432_v32 = vld [vmem:[#allocation12 + $0xc] sm:$0xf0]  ;;  %v2143_v35 = vld [vmem:[#allocation12 + $0x100] sm:$0xf]  ;;  %v2430_v37 = vld [vmem:[#allocation12 + $0x4] sm:$0xf]  ;;  %v2164_v38 = vor.u32 %v2466_v27, %v2161_v28 }
 0x1ce   : > { %1135 = vmatpush.bf16.msra.mxu1 %v2192_v0  ;;  %1149 = vmatpush.bf16.msra.mxu2 %v2068_v1  ;;  %v2464_v36 = vld [vmem:[#allocation12 + $0x10c] sm:$0xf0]  ;;  %v2017_v39 = vld [vmem:[#allocation12 + $0x10] sm:$0xf0]  ;;  %v2462_v40 = vld [vmem:[#allocation12 + $0x104] sm:$0xf]  ;;  %v2016_v45 = vor.u32 %v2432_v32, %v2015_v30 }
 0x1cf   : > { %1163 = vmatpush.bf16.msra.mxu3 %v2196_v6  ;;  %v2145_v41 = vld [vmem:[#allocation12 + $0x110] sm:$0xf0]  ;;  %v2135_v42 = vld [vmem:[#allocation12 + $0xe8] sm:$0xf]  ;;  %v2461_v43 = vld [vmem:[#allocation12 + $0xf4] sm:$0xf0]  ;;  %v2144_v49 = vor.u32 %v2464_v36, %v2143_v35  ;;  %v2020_v50 = vor.u32 %v2430_v37, %v2017_v39 }
 0x1d0   : > { %v2263_v44 = vld [vmem:[#allocation12 + $0x1e8] sm:$0xf]  ;;  %v2493_v46 = vld [vmem:[#allocation12 + $0x1f4] sm:$0xf0]  ;;  %v2459_v47 = vld [vmem:[#allocation12 + $0xec] sm:$0xf]  ;;  %v2148_v53 = vor.u32 %v2462_v40, %v2145_v41  ;;  %v2136_v54 = vor.u32 %v2461_v43, %v2135_v42 }
 0x1d1   : > { %1122 = vmatpush.bf16.msra.mxu0 %v2048_v12  ;;  %v2137_v48 = vld [vmem:[#allocation12 + $0xf8] sm:$0xf0]  ;;  %v2491_v51 = vld [vmem:[#allocation12 + $0x1ec] sm:$0xf]  ;;  %v2264_v55 = vor.u32 %v2493_v46, %v2263_v44  ;;  %v2119_v57 = vld [vmem:[#allocation12 + $0xc8] sm:$0xf] }
 0x1d2   : > { %1136 = vmatpush.bf16.msra.mxu1 %v2176_v13  ;;  %1150 = vmatpush.bf16.msra.mxu2 %v2052_v18  ;;  %v2265_v52 = vld [vmem:[#allocation12 + $0x1f8] sm:$0xf0]  ;;  %v2140_v56 = vor.u32 %v2459_v47, %v2137_v48  ;;  %v2457_v58 = vld [vmem:[#allocation12 + $0xd4] sm:$0xf0]  ;;  %v2247_v59 = vld [vmem:[#allocation12 + $0x1c8] sm:$0xf] }
 0x1d3   : > { %1164 = vmatpush.bf16.msra.mxu3 %v2180_v22  ;;  %v2268_v60 = vor.u32 %v2491_v51, %v2265_v52  ;;  %v2489_v61 = vld [vmem:[#allocation12 + $0x1d4] sm:$0xf0]  ;;  %v2455_v62 = vld [vmem:[#allocation12 + $0xcc] sm:$0xf]  ;;  %v2121_v63 = vld [vmem:[#allocation12 + $0xd8] sm:$0xf0]  ;;  %v2120_v3 = vor.u32 %v2457_v58, %v2119_v57 }
 0x1d4   : > { %v2487_v0 = vld [vmem:[#allocation12 + $0x1cc] sm:$0xf]  ;;  %v2249_v1 = vld [vmem:[#allocation12 + $0x1d8] sm:$0xf0]  ;;  %v684_v2 = vld [vmem:[#allocation2] sm:$0x3]  ;;  %v2248_v8 = vor.u32 %v2489_v61, %v2247_v59  ;;  %v2124_v9 = vor.u32 %v2455_v62, %v2121_v63 }
 0x1d5   : > { %1123 = vmatpush.bf16.msra.mxu0 %v2032_v29  ;;  %v2103_v5 = vld [vmem:[#allocation12 + $0xa8] sm:$0xf]  ;;  %v3226_v6 = vmul.f32 0.025, %v684_v2  ;;  %v686_v7 = vld [vmem:[#allocation3] sm:$0x3]  ;;  %v2252_v13 = vor.u32 %v2487_v0, %v2249_v1 }
 0x1d6   : > { %1137 = vmatpush.bf16.msra.mxu1 %v2160_v33  ;;  %1151 = vmatpush.bf16.msra.mxu2 %v2036_v34  ;;  %v2453_v10 = vld [vmem:[#allocation12 + $0xb4] sm:$0xf0]  ;;  %v2231_v11 = vld [vmem:[#allocation12 + $0x1a8] sm:$0xf]  ;;  %v687_v12 = vmul.f32 0.025, %v686_v7 }
 0x1d7   : > { %1165 = vmatpush.bf16.msra.mxu3 %v2164_v38  ;;  %v2485_v18 = vld [vmem:[#allocation12 + $0x1b4] sm:$0xf0]  ;;  %v2451_v19 = vld [vmem:[#allocation12 + $0xac] sm:$0xf]  ;;  %v2105_v20 = vld [vmem:[#allocation12 + $0xb8] sm:$0xf0]  ;;  %v688_v21 = vmul.f32 %v3226_v6, %v3226_v6  ;;  %v2104_v24 = vor.u32 %v2453_v10, %v2103_v5 }
 0x1d8   : > { %v2483_v22 = vld [vmem:[#allocation12 + $0x1ac] sm:$0xf]  ;;  %v2233_v23 = vld [vmem:[#allocation12 + $0x1b8] sm:$0xf0]  ;;  %v2087_v26 = vld [vmem:[#allocation12 + $0x88] sm:$0xf]  ;;  %v2232_v28 = vor.u32 %v2485_v18, %v2231_v11  ;;  %v2108_v29 = vor.u32 %v2451_v19, %v2105_v20 }
 0x1d9   : > { %1124 = vmatpush.bf16.msra.mxu0 %v2016_v45  ;;  %v689_v27 = vsub.f32 %v687_v12, %v688_v21  ;;  %v2449_v30 = vld [vmem:[#allocation12 + $0x94] sm:$0xf0]  ;;  %v2215_v32 = vld [vmem:[#allocation12 + $0x188] sm:$0xf]  ;;  %v2236_v34 = vor.u32 %v2483_v22, %v2233_v23  ;;  %v2447_v35 = vld [vmem:[#allocation12 + $0x8c] sm:$0xf] }
 0x1da   : > { %1138 = vmatpush.bf16.msra.mxu1 %v2144_v49  ;;  %1152 = vmatpush.bf16.msra.mxu2 %v2020_v50  ;;  %v2481_v33 = vld [vmem:[#allocation12 + $0x194] sm:$0xf0]  ;;  %v2089_v36 = vld [vmem:[#allocation12 + $0x98] sm:$0xf0]  ;;  %v2479_v38 = vld [vmem:[#allocation12 + $0x18c] sm:$0xf]  ;;  %v2088_v40 = vor.u32 %v2449_v30, %v2087_v26 }
 0x1db   : > { %1166 = vmatpush.bf16.msra.mxu3 %v2148_v53  ;;  %v690_v37 = vmax.f32 %v689_v27, 0.0  ;;  %v2217_v39 = vld [vmem:[#allocation12 + $0x198] sm:$0xf0]  ;;  %v2216_v42 = vor.u32 %v2481_v33, %v2215_v32  ;;  %v2092_v43 = vor.u32 %v2447_v35, %v2089_v36  ;;  %v2071_v45 = vld [vmem:[#allocation12 + $0x68] sm:$0xf] }
 0x1dc   : > { %v2220_v44 = vor.u32 %v2479_v38, %v2217_v39  ;;  %v2445_v46 = vld [vmem:[#allocation12 + $0x74] sm:$0xf0]  ;;  %v2199_v47 = vld [vmem:[#allocation12 + $0x168] sm:$0xf]  ;;  %v2443_v50 = vld [vmem:[#allocation12 + $0x6c] sm:$0xf] }
 0x1dd   : > { %1173 = vmatpush.bf16.msrb.mxu0 %v2136_v54  ;;  %v3230_v41 = vadd.f32 1e-05, %v690_v37  ;;  %v2072_v48 = vor.u32 %v2445_v46, %v2071_v45  ;;  %v2477_v49 = vld [vmem:[#allocation12 + $0x174] sm:$0xf0]  ;;  %v2073_v51 = vld [vmem:[#allocation12 + $0x78] sm:$0xf0] }
 0x1de   : > { %1187 = vmatpush.bf16.msrb.mxu1 %v2264_v55  ;;  %1201 = vmatpush.bf16.msrb.mxu2 %v2140_v56  ;;  %v2200_v52 = vor.u32 %v2477_v49, %v2199_v47  ;;  %v2076_v53 = vor.u32 %v2443_v50, %v2073_v51  ;;  %v2475_v54 = vld [vmem:[#allocation12 + $0x16c] sm:$0xf]  ;;  %v2201_v55 = vld [vmem:[#allocation12 + $0x178] sm:$0xf0]  ;;  %v2055_v56 = vld [vmem:[#allocation12 + $0x48] sm:$0xf] }
 0x1df   : > { %1215 = vmatpush.bf16.msrb.mxu3 %v2268_v60  ;;  %2667 = vrsqrt.f32 %v3230_v41  ;;  %v2204_v58 = vor.u32 %v2475_v54, %v2201_v55  ;;  %v2441_v59 = vld [vmem:[#allocation12 + $0x54] sm:$0xf0]  ;;  %v2183_v60 = vld [vmem:[#allocation12 + $0x148] sm:$0xf]  ;;  %v2439_v1 = vld [vmem:[#allocation12 + $0x4c] sm:$0xf]  ;;  %vm698_vm6 = vweird.f32 %v3230_v41 }
 0x1e0   : > { %v2473_v61 = vld [vmem:[#allocation12 + $0x154] sm:$0xf0]  ;;  %v2056_v63 = vor.u32 %v2441_v59, %v2055_v56  ;;  %v2057_v2 = vld [vmem:[#allocation12 + $0x58] sm:$0xf0]  ;;  %v2167_v12 = vld [vmem:[#allocation12 + $0x128] sm:$0xf] }
 0x1e1   : > { %1174 = vmatpush.bf16.msrb.mxu0 %v2120_v3  ;;  %v2184_v0 = vor.u32 %v2473_v61, %v2183_v60  ;;  %v2471_v3 = vld [vmem:[#allocation12 + $0x14c] sm:$0xf]  ;;  %v2060_v5 = vor.u32 %v2439_v1, %v2057_v2  ;;  %v2185_v7 = vld [vmem:[#allocation12 + $0x158] sm:$0xf0]  ;;  %v2437_v11 = vld [vmem:[#allocation12 + $0x34] sm:$0xf0] }
 0x1e2   : > { %1188 = vmatpush.bf16.msrb.mxu1 %v2248_v8  ;;  %1202 = vmatpush.bf16.msrb.mxu2 %v2124_v9  ;;  %v2039_v8 = vld [vmem:[#allocation12 + $0x28] sm:$0xf]  ;;  %v2188_v10 = vor.u32 %v2471_v3, %v2185_v7  ;;  %v2435_v19 = vld [vmem:[#allocation12 + $0x2c] sm:$0xf]  ;;  %v2041_v20 = vld [vmem:[#allocation12 + $0x38] sm:$0xf0] }
 0x1e3   : > { %1216 = vmatpush.bf16.msrb.mxu3 %v2252_v13  ;;  %v2469_v13 = vld [vmem:[#allocation12 + $0x134] sm:$0xf0]  ;;  %v2040_v18 = vor.u32 %v2437_v11, %v2039_v8  ;;  %v2467_v21 = vld [vmem:[#allocation12 + $0x12c] sm:$0xf]  ;;  %v2169_v26 = vld [vmem:[#allocation12 + $0x138] sm:$0xf0] }
 0x1e4   : > { %v2168_v23 = vor.u32 %v2469_v13, %v2167_v12  ;;  %v2023_v27 = vld [vmem:[#allocation12 + $0x8] sm:$0xf]  ;;  %v2465_v32 = vld [vmem:[#allocation12 + $0x114] sm:$0xf0]  ;;  %v2025_v35 = vld [vmem:[#allocation12 + $0x18] sm:$0xf0] }
 0x1e5   : > { %1175 = vmatpush.bf16.msrb.mxu0 %v2104_v24  ;;  %v2668_v57 = vpop.eup %2667  ;;  %v2044_v24 = vor.u32 %v2435_v19, %v2041_v20  ;;  %v2151_v30 = vld [vmem:[#allocation12 + $0x108] sm:$0xf]  ;;  %v2463_v37 = vld [vmem:[#allocation12 + $0x10c] sm:$0xf]  ;;  %v2153_v38 = vld [vmem:[#allocation12 + $0x118] sm:$0xf0] }
 0x1e6   : > { %1189 = vmatpush.bf16.msrb.mxu1 %v2232_v28  ;;  %1203 = vmatpush.bf16.msrb.mxu2 %v2108_v29  ;;  %v693_v62 = vmul.f32 %v2668_v57, %v3230_v41  ;;  %vm699_vm7 = vweird.f32 %v2668_v57  ;;  %v2172_v28 = vor.u32 %v2467_v21, %v2169_v26  ;;  %v2433_v29 = vld [vmem:[#allocation12 + $0x14] sm:$0xf0]  ;;  %v682_v39 = vld [vmem:[#allocation15] sm:$0x3]  ;;  %v683_v47 = vld [vmem:[#allocation15 + $0x2] sm:$0x3] }
 0x1e7   : > { %1217 = vmatpush.bf16.msrb.mxu3 %v2236_v34  ;;  %v2431_v34 = vld [vmem:[#allocation12 + $0xc] sm:$0xf]  ;;  %vm700_vm8 = vmor %vm698_vm6, %vm699_vm7  ;;  %v2024_v36 = vor.u32 %v2433_v29, %v2023_v27 }
 0x1e8   : > { %v694_v9 = vmul.f32 %v2668_v57, %v693_v62 }
 0x1e9   : > { %1176 = vmatpush.bf16.msrb.mxu0 %v2088_v40 }
 0x1ea   : > { %1190 = vmatpush.bf16.msrb.mxu1 %v2216_v42  ;;  %1204 = vmatpush.bf16.msrb.mxu2 %v2092_v43  ;;  %v695_v22 = vmul.f32 0.5, %v694_v9  ;;  %v2152_v42 = vor.u32 %v2465_v32, %v2151_v30  ;;  %v2028_v43 = vor.u32 %v2431_v34, %v2025_v35 }
 0x1eb   : > { %1218 = vmatpush.bf16.msrb.mxu3 %v2220_v44  ;;  %v2156_v44 = vor.u32 %v2463_v37, %v2153_v38 }
 0x1ec   : > { %v696_v33 = vsub.f32 1.5, %v695_v22 }
 0x1ed   : > { %1177 = vmatpush.bf16.msrb.mxu0 %v2072_v48 }
 0x1ee   : > { %1191 = vmatpush.bf16.msrb.mxu1 %v2200_v52  ;;  %1205 = vmatpush.bf16.msrb.mxu2 %v2076_v53  ;;  %v697_v40 = vmul.f32 %v2668_v57, %v696_v33 }
 0x1ef   : > { %1219 = vmatpush.bf16.msrb.mxu3 %v2204_v58 }
 0x1f0   : > { %v701_v45 = vsel %vm700_vm8, %v2668_v57, %v697_v40 }
 0x1f1   : > { %1178 = vmatpush.bf16.msrb.mxu0 %v2056_v63  ;;  %v702_v46 = vmul.f32 %v701_v45, %v682_v39 }
 0x1f2   : > { %1192 = vmatpush.bf16.msrb.mxu1 %v2184_v0  ;;  %1206 = vmatpush.bf16.msrb.mxu2 %v2060_v5 }
 0x1f3   : > { %1220 = vmatpush.bf16.msrb.mxu3 %v2188_v10  ;;  %v703_v41 = vmul.f32 %v702_v46, %v3226_v6  ;;  %v706_v48 = vperm.slane %v702_v46, 0  ;;  %v707_v49 = vperm.slane %v702_v46, 1 }
 0x1f5   : > { %1179 = vmatpush.bf16.msrb.mxu0 %v2040_v18  ;;  %v704_v50 = vsub.f32 %v683_v47, %v703_v41  ;;  %v710_v51 = vmul.f32 %v706_v48, %v3207_v14  ;;  %v712_v52 = vmul.f32 %v706_v48, %v3211_v16  ;;  %v711_v53 = vmul.f32 %v707_v49, %v3209_v15 }
 0x1f6   : > { %1193 = vmatpush.bf16.msrb.mxu1 %v2168_v23  ;;  %1207 = vmatpush.bf16.msrb.mxu2 %v2044_v24  ;;  %v713_v54 = vmul.f32 %v707_v49, %v3213_v17 }
 0x1f7   : > { %1221 = vmatpush.bf16.msrb.mxu3 %v2172_v28  ;;  %v715_v55 = vperm.slane %v704_v50, 0  ;;  %v716_v56 = vperm.slane %v704_v50, 1 }
 0x1f9   : > { %1180 = vmatpush.bf16.msrb.mxu0 %v2024_v36  ;;  %v719_v57 = vadd.f32 %v715_v55, %v710_v51  ;;  %v721_v58 = vadd.f32 %v715_v55, %v712_v52  ;;  %v720_v59 = vadd.f32 %v716_v56, %v711_v53  ;;  %v722_v60 = vadd.f32 %v716_v56, %v713_v54 }
 0x1fa   : > { %1194 = vmatpush.bf16.msrb.mxu1 %v2152_v42  ;;  %1208 = vmatpush.bf16.msrb.mxu2 %v2028_v43 }
 0x1fb   : > { %1222 = vmatpush.bf16.msrb.mxu3 %v2156_v44  ;;  %v723_v61 = vmul.f32 0.2, %v719_v57  ;;  %v725_v6 = vmul.f32 0.2, %v721_v58  ;;  %v724_v62 = vmul.f32 0.2, %v720_v59 }
 0x1fc   : > { %v726_v63 = vmul.f32 0.2, %v722_v60 }
 0x1fd   : > { %v727_v0 = vmax.f32 %v719_v57, %v723_v61  ;;  %v729_v1 = vmax.f32 %v721_v58, %v725_v6  ;;  %v728_v2 = vmax.f32 %v720_v59, %v724_v62 }
 0x1fe   : > { %v730_v14 = vmax.f32 %v722_v60, %v726_v63 }
 0x1ff   : > { %v731_v3 = vpack.c.bf16 %v729_v1, %v727_v0 }
 0x200   : > { %v732_v16 = vpack.c.bf16 %v730_v14, %v728_v2 }
 0x201   : > { %1125 = vmatmul.bf16.vlgmr.msra.gmra.mxu0 %v731_v3  ;;  %1153 = vmatmul.bf16.vlgmr.msra.gmra.mxu2 %v731_v3 }
 0x202   : > { %1139 = vmatmul.bf16.vlgmr.msra.gmra.mxu1 %v732_v16  ;;  %1167 = vmatmul.bf16.vlgmr.msra.gmra.mxu3 %v732_v16 }
 0x211   : > { %1181 = vmatmul.bf16.vlgmr.msrb.gmra.mxu0 %v731_v3  ;;  %1209 = vmatmul.bf16.vlgmr.msrb.gmra.mxu2 %v731_v3 }
 0x212   : > { %1195 = vmatmul.bf16.vlgmr.msrb.gmra.mxu1 %v732_v16  ;;  %1223 = vmatmul.bf16.vlgmr.msrb.gmra.mxu3 %v732_v16 }
 0x27e   : > { %v1126_v15 = vpop.f32.mrf.mxu0 }
 0x27f   : > { %v1140_v17 = vpop.f32.mrf.mxu1 }
 0x280   : > { %v3243_v5 = vadd.f32 %v1140_v17, %v1126_v15 }
 0x284   : > { %v1154_v7 = vpop.f32.mrf.mxu2 }
 0x285   : > { %v1168_v8 = vpop.f32.mrf.mxu3 }
 0x286   : > { %v3245_v9 = vadd.f32 %v1168_v8, %v1154_v7  ;;  %v1128_v10 = vpop.f32.mrf.mxu0 }
 0x287   : > { %v1142_v11 = vpop.f32.mrf.mxu1 }
 0x288   : > { %v3247_v12 = vadd.f32 %v1142_v11, %v1128_v10 }
 0x28c   : > { %v1156_v13 = vpop.f32.mrf.mxu2 }
 0x28d   : > { %v1170_v18 = vpop.f32.mrf.mxu3 }
 0x28e   : > { %v3249_v19 = vadd.f32 %v1170_v18, %v1156_v13  ;;  %v1182_v20 = vpop.f32.mrf.mxu0 }
 0x28f   : > { %v1196_v21 = vpop.f32.mrf.mxu1 }
 0x290   : > { %v3251_v22 = vadd.f32 %v1196_v21, %v1182_v20 }
 0x294   : > { %v1210_v23 = vpop.f32.mrf.mxu2 }
 0x295   : > { %v1224_v24 = vpop.f32.mrf.mxu3 }
 0x296   : > { %v3253_v26 = vadd.f32 %v1224_v24, %v1210_v23  ;;  %v1184_v27 = vpop.f32.mrf.mxu0 }
 0x297   : > { %v1198_v28 = vpop.f32.mrf.mxu1 }
 0x298   : > { %v3255_v29 = vadd.f32 %v1198_v28, %v1184_v27 }
 0x29a   : > { %1231 = sbr.rel (%p2269_p13) target bundleno = 700 (0x2bc), region = 88 }
 0x29c   : > { %v1212_v30 = vpop.f32.mrf.mxu2 }
 0x29d   : > { %v1226_v32 = vpop.f32.mrf.mxu3 }
 0x29e   : > { %v3257_v33 = vadd.f32 %v1226_v32, %v1212_v30 }
 0x29f   : > { %v1232_v34 = vmul.f32 %v3202_v25, %v3243_v5  ;;  %v1233_v35 = vmul.f32 %v3202_v25, %v3245_v9  ;;  %v1234_v36 = vmul.f32 %v3202_v25, %v3251_v22  ;;  %v1235_v37 = vmul.f32 %v3202_v25, %v3253_v26 }
 0x2a0   : > { %v1236_v38 = vmul.f32 %v3204_v31, %v3247_v12  ;;  %v1237_v39 = vmul.f32 %v3204_v31, %v3249_v19  ;;  %v1238_v40 = vmul.f32 %v3204_v31, %v3255_v29  ;;  %v1239_v42 = vmul.f32 %v3204_v31, %v3257_v33 }
 0x2a1   : > { %v1290_v47 = vmul.f32 %v1232_v34, %v1232_v34  ;;  %v1291_v41 = vmul.f32 %v1233_v35, %v1233_v35  ;;  %v1292_v48 = vmul.f32 %v1234_v36, %v1234_v36  ;;  %v1293_v25 = vmul.f32 %v1235_v37, %v1235_v37 }
 0x2a2   : > { %v1241_v43 = vadd.f32 %v1236_v38, %v1232_v34  ;;  %v1248_v44 = vadd.f32 %v1237_v39, %v1233_v35  ;;  %v1255_v45 = vadd.f32 %v1238_v40, %v1234_v36  ;;  %v1262_v46 = vadd.f32 %v1239_v42, %v1235_v37 }
 0x2a3   : > { %v1294_v53 = vmul.f32 %v1236_v38, %v1236_v38  ;;  %v1295_v54 = vmul.f32 %v1237_v39, %v1237_v39  ;;  %v1296_v55 = vmul.f32 %v1238_v40, %v1238_v40  ;;  %v1297_v56 = vmul.f32 %v1239_v42, %v1239_v42 }
 0x2a4   : > { %v1242_v49 = vrot.slane %v1241_v43, 4  ;;  %v1249_v50 = vrot.slane %v1248_v44, 4  ;;  %v1256_v51 = vrot.slane %v1255_v45, 4  ;;  %v1263_v52 = vrot.slane %v1262_v46, 4 }
 0x2a5   : > { %vm1276_vm9 = vcmask 1040384   ;;  %vm1278_vm10 = vcmask 1042434   ;;  %v1298_v60 = vadd.f32 %v1294_v53, %v1290_v47  ;;  %v1305_v61 = vadd.f32 %v1295_v54, %v1291_v41  ;;  %v1240_v47 = vld [vmem:[#allocation4] sm:$0xf] }
 0x2a6   : > { %v1243_v57 = vadd.f32 %v1242_v49, %v1241_v43  ;;  %v1250_v58 = vadd.f32 %v1249_v50, %v1248_v44  ;;  %v1257_v59 = vadd.f32 %v1256_v51, %v1255_v45  ;;  %v1264_v31 = vadd.f32 %v1263_v52, %v1262_v46 }
 0x2a7   : > { %v1312_v6 = vadd.f32 %v1296_v55, %v1292_v48  ;;  %v1319_v62 = vadd.f32 %v1297_v56, %v1293_v25  ;;  %v1299_v14 = vrot.slane %v1298_v60, 4  ;;  %v1306_v3 = vrot.slane %v1305_v61, 4 }
 0x2a8   : > { %v1244_v63 = vrot.slane %v1243_v57, 2  ;;  %v1251_v0 = vrot.slane %v1250_v58, 2  ;;  %v1258_v1 = vrot.slane %v1257_v59, 2  ;;  %v1265_v2 = vrot.slane %v1264_v31, 2 }
 0x2a9   : > { %v1313_v16 = vrot.slane %v1312_v6, 4  ;;  %v1320_v15 = vrot.slane %v1319_v62, 4  ;;  %v1300_v11 = vadd.f32 %v1299_v14, %v1298_v60  ;;  %v1307_v13 = vadd.f32 %v1306_v3, %v1305_v61  ;;  %v1289_v61 = vld [vmem:[#allocation5] sm:$0xf] }
 0x2aa   : > { %v1245_v17 = vadd.f32 %v1244_v63, %v1243_v57  ;;  %v1252_v7 = vadd.f32 %v1251_v0, %v1250_v58  ;;  %v1259_v8 = vadd.f32 %v1258_v1, %v1257_v59  ;;  %v1266_v10 = vadd.f32 %v1265_v2, %v1264_v31 }
 0x2ab   : > { %v1314_v18 = vadd.f32 %v1313_v16, %v1312_v6  ;;  %v1321_v20 = vadd.f32 %v1320_v15, %v1319_v62  ;;  %v1301_v28 = vrot.slane %v1300_v11, 2  ;;  %v1308_v30 = vrot.slane %v1307_v13, 2 }
 0x2ac   : > { %v1246_v21 = vrot.slane %v1245_v17, 1  ;;  %v1253_v23 = vrot.slane %v1252_v7, 1  ;;  %v1260_v24 = vrot.slane %v1259_v8, 1  ;;  %v1267_v27 = vrot.slane %v1266_v10, 1 }
 0x2ad   : > { %v1315_v32 = vrot.slane %v1314_v18, 2  ;;  %v1322_v34 = vrot.slane %v1321_v20, 2  ;;  %v1302_v39 = vadd.f32 %v1301_v28, %v1300_v11  ;;  %v1309_v40 = vadd.f32 %v1308_v30, %v1307_v13 }
 0x2ae   : > { %v1247_v35 = vadd.f32 %v1246_v21, %v1245_v17  ;;  %v1254_v36 = vadd.f32 %v1253_v23, %v1252_v7  ;;  %v1261_v37 = vadd.f32 %v1260_v24, %v1259_v8  ;;  %v1268_v38 = vadd.f32 %v1267_v27, %v1266_v10 }
 0x2af   : > { %v1316_v42 = vadd.f32 %v1315_v32, %v1314_v18  ;;  %v1323_v43 = vadd.f32 %v1322_v34, %v1321_v20  ;;  %vm1280_vm11 = vcmask 1041408   ;;  %v1303_v41 = vrot.slane %v1302_v39, 1 }
 0x2b0   : > { %v1273_v44 = vrot.slane %v1254_v36, 7  ;;  %v1274_v45 = vrot.slane %v1261_v37, 6  ;;  %v1275_v46 = vrot.slane %v1268_v38, 5  ;;  %v1310_v48 = vrot.slane %v1309_v40, 1 }
 0x2b1   : > { %v1317_v25 = vrot.slane %v1316_v42, 1  ;;  %v1324_v49 = vrot.slane %v1323_v43, 1  ;;  %vm3279_vm12 = vcmp.lt.s32.totalorder %v390_v4, 512  ;;  %v1304_v54 = vadd.f32 %v1303_v41, %v1302_v39 }
 0x2b2   : > { %v1277_v50 = vsel %vm1276_vm9, %v1247_v35, %v1273_v44  ;;  %v1279_v51 = vsel %vm1278_vm10, %v1274_v45, %v1275_v46  ;;  %v1311_v55 = vadd.f32 %v1310_v48, %v1309_v40 }
 0x2b3   : > { %v1281_v53 = vsel %vm1280_vm11, %v1277_v50, %v1279_v51  ;;  %v1318_v56 = vadd.f32 %v1317_v25, %v1316_v42  ;;  %v1325_v58 = vadd.f32 %v1324_v49, %v1323_v43 }
 0x2b4   : > { %v1283_v57 = vadd.f32 %v1281_v53, %v1240_v47  ;;  %v1330_v59 = vrot.slane %v1311_v55, 7 }
 0x2b5   : > { %v1331_v31 = vrot.slane %v1318_v56, 6  ;;  %v1332_v60 = vrot.slane %v1325_v58, 5 }
 0x2b6   : > { %1288 = vst.msk [vmem:[#allocation4] sm:$0xf] %vm3279_vm12, %v1283_v57  ;;  %v1333_v6 = vsel %vm1276_vm9, %v1304_v54, %v1330_v59 }
 0x2b7   : > { %v1334_v4 = vsel %vm1278_vm10, %v1331_v31, %v1332_v60 }
 0x2b8   : > { %v1335_v62 = vsel %vm1280_vm11, %v1333_v6, %v1334_v4 }
 0x2b9   : > { %v1337_v63 = vadd.f32 %v1335_v62, %v1289_v61 }
 0x2bb   : > { %1338 = vst.msk [vmem:[#allocation5] sm:$0xf] %vm3279_vm12, %v1337_v63 }
 0x2bc PF: > { %p2270_p0 = scmp.ne.s32.totalorder %s2954_s25, 2 }
 0x2be   : > { %1342 = sbr.rel (%p2270_p0) target bundleno = 909 (0x38d), region = 92 }
 0x2c3   : > { %v2501_v0 = vld [vmem:[#allocation14 + $0x38] sm:$0xff]  ;;  %v2500_v3 = vld [vmem:[#allocation14 + $0x30] sm:$0xff]  ;;  %v2499_v7 = vld [vmem:[#allocation14 + $0x28] sm:$0xff] }
 0x2c4   : > { %v2509_v1 = vld [vmem:[#allocation14 + $0x78] sm:$0xff]  ;;  %1680 = vmatpush.bf16.msra.mxu0 %v2501_v0  ;;  %v2508_v16 = vld [vmem:[#allocation14 + $0x70] sm:$0xff]  ;;  %v2507_v8 = vld [vmem:[#allocation14 + $0x68] sm:$0xff] }
 0x2c5   : > { %v2517_v2 = vld [vmem:[#allocation14 + $0xb8] sm:$0xff]  ;;  %1694 = vmatpush.bf16.msra.mxu1 %v2509_v1  ;;  %v2516_v15 = vld [vmem:[#allocation14 + $0xb0] sm:$0xff]  ;;  %v2515_v10 = vld [vmem:[#allocation14 + $0xa8] sm:$0xff] }
 0x2c6   : > { %v2525_v14 = vld [vmem:[#allocation14 + $0xf8] sm:$0xff]  ;;  %1708 = vmatpush.bf16.msra.mxu2 %v2517_v2  ;;  %v2524_v17 = vld [vmem:[#allocation14 + $0xf0] sm:$0xff]  ;;  %v2523_v11 = vld [vmem:[#allocation14 + $0xe8] sm:$0xff] }
 0x2c7   : > { %1722 = vmatpush.bf16.msra.mxu3 %v2525_v14  ;;  %v2498_v13 = vld [vmem:[#allocation14 + $0x20] sm:$0xff]  ;;  %v1345_v23 = vld [vmem:[#allocation4] sm:$0xf]  ;;  %v1347_v24 = vld [vmem:[#allocation5] sm:$0xf] }
 0x2c8   : > { %1681 = vmatpush.bf16.msra.mxu0 %v2500_v3  ;;  %v2506_v18 = vld [vmem:[#allocation14 + $0x60] sm:$0xff]  ;;  %v1346_v27 = vmul.f32 0.025, %v1345_v23  ;;  %v1348_v28 = vmul.f32 0.025, %v1347_v24  ;;  %v2497_v30 = vld [vmem:[#allocation14 + $0x18] sm:$0xff] }
 0x2c9   : > { %1695 = vmatpush.bf16.msra.mxu1 %v2508_v16  ;;  %v2514_v20 = vld [vmem:[#allocation14 + $0xa0] sm:$0xff]  ;;  %v2505_v32 = vld [vmem:[#allocation14 + $0x58] sm:$0xff]  ;;  %v2496_v38 = vld [vmem:[#allocation14 + $0x10] sm:$0xff] }
 0x2ca   : > { %1709 = vmatpush.bf16.msra.mxu2 %v2516_v15  ;;  %v2522_v21 = vld [vmem:[#allocation14 + $0xe0] sm:$0xff]  ;;  %v1349_v34 = vmul.f32 %v1346_v27, %v1346_v27  ;;  %v2513_v35 = vld [vmem:[#allocation14 + $0x98] sm:$0xff]  ;;  %v2504_v39 = vld [vmem:[#allocation14 + $0x50] sm:$0xff] }
 0x2cb   : > { %1723 = vmatpush.bf16.msra.mxu3 %v2524_v17  ;;  %v2521_v36 = vld [vmem:[#allocation14 + $0xd8] sm:$0xff]  ;;  %v2512_v42 = vld [vmem:[#allocation14 + $0x90] sm:$0xff]  ;;  %v2495_v45 = vld [vmem:[#allocation14 + $0x8] sm:$0xff] }
 0x2cc   : > { %1682 = vmatpush.bf16.msra.mxu0 %v2499_v7  ;;  %v1350_v37 = vsub.f32 %v1348_v28, %v1349_v34  ;;  %v2520_v43 = vld [vmem:[#allocation14 + $0xd0] sm:$0xff]  ;;  %v2503_v46 = vld [vmem:[#allocation14 + $0x48] sm:$0xff]  ;;  %v2494_v48 = vld [vmem:[#allocation14] sm:$0xff] }
 0x2cd   : > { %1696 = vmatpush.bf16.msra.mxu1 %v2507_v8  ;;  %v2511_v47 = vld [vmem:[#allocation14 + $0x88] sm:$0xff]  ;;  %v2502_v25 = vld [vmem:[#allocation14 + $0x40] sm:$0xff] }
 0x2ce   : > { %1710 = vmatpush.bf16.msra.mxu2 %v2515_v10  ;;  %v1351_v40 = vmax.f32 %v1350_v37, 0.0  ;;  %v2519_v41 = vld [vmem:[#allocation14 + $0xc8] sm:$0xff]  ;;  %v2510_v49 = vld [vmem:[#allocation14 + $0x80] sm:$0xff] }
 0x2cf   : > { %1724 = vmatpush.bf16.msra.mxu3 %v2523_v11  ;;  %v2518_v50 = vld [vmem:[#allocation14 + $0xc0] sm:$0xff]  ;;  %v1344_v31 = vld [vmem:[#allocation15 + $0x8] sm:$0xf] }
 0x2d0   : > { %1683 = vmatpush.bf16.msra.mxu0 %v2498_v13  ;;  %v1352_v44 = vadd.f32 1e-05, %v1351_v40  ;;  %v1343_v56 = vld [vmem:[#allocation15 + $0x4] sm:$0xf] }
 0x2d1   : > { %1697 = vmatpush.bf16.msra.mxu1 %v2506_v18 }
 0x2d2   : > { %1711 = vmatpush.bf16.msra.mxu2 %v2514_v20  ;;  %2670 = vrsqrt.f32 %v1352_v44  ;;  %vm1359_vm13 = vweird.f32 %v1352_v44 }
 0x2d3   : > { %1725 = vmatpush.bf16.msra.mxu3 %v2522_v21 }
 0x2d4   : > { %1684 = vmatpush.bf16.msra.mxu0 %v2497_v30 }
 0x2d5   : > { %1698 = vmatpush.bf16.msra.mxu1 %v2505_v32 }
 0x2d6   : > { %1712 = vmatpush.bf16.msra.mxu2 %v2513_v35 }
 0x2d7   : > { %1726 = vmatpush.bf16.msra.mxu3 %v2521_v36 }
 0x2d8   : > { %1685 = vmatpush.bf16.msra.mxu0 %v2496_v38  ;;  %v2671_v51 = vpop.eup %2670 }
 0x2d9   : > { %1699 = vmatpush.bf16.msra.mxu1 %v2504_v39  ;;  %v1354_v52 = vmul.f32 %v2671_v51, %v1352_v44  ;;  %vm1360_vm14 = vweird.f32 %v2671_v51 }
 0x2da   : > { %1713 = vmatpush.bf16.msra.mxu2 %v2512_v42  ;;  %vm1361_vm15 = vmor %vm1359_vm13, %vm1360_vm14 }
 0x2db   : > { %1727 = vmatpush.bf16.msra.mxu3 %v2520_v43  ;;  %v1355_v53 = vmul.f32 %v2671_v51, %v1354_v52 }
 0x2dc   : > { %1686 = vmatpush.bf16.msra.mxu0 %v2495_v45  ;;  %v2669_v45 = vld [vmem:[#allocation15 + $0xc] ss:$0 sm:$0xff] }
 0x2dd   : > { %1700 = vmatpush.bf16.msra.mxu1 %v2503_v46  ;;  %v1356_v54 = vmul.f32 0.5, %v1355_v53 }
 0x2de   : > { %1714 = vmatpush.bf16.msra.mxu2 %v2511_v47 }
 0x2df   : > { %1728 = vmatpush.bf16.msra.mxu3 %v2519_v41  ;;  %v1357_v55 = vsub.f32 1.5, %v1356_v54 }
 0x2e0   : > { %1687 = vmatpush.bf16.msra.mxu0 %v2494_v48 }
 0x2e1   : > { %1701 = vmatpush.bf16.msra.mxu1 %v2502_v25  ;;  %v1358_v57 = vmul.f32 %v2671_v51, %v1357_v55 }
 0x2e2   : > { %1715 = vmatpush.bf16.msra.mxu2 %v2510_v49 }
 0x2e3   : > { %1729 = vmatpush.bf16.msra.mxu3 %v2518_v50  ;;  %v1362_v58 = vsel %vm1361_vm15, %v2671_v51, %v1358_v57 }
 0x2e4   : > { %v1363_v59 = vmul.f32 %v1362_v58, %v1343_v56 }
 0x2e6   : > { %v1364_v60 = vmul.f32 %v1363_v59, %v1346_v27  ;;  %v1367_v61 = vperm.slane %v1363_v59, 0  ;;  %v1368_v6 = vperm.slane %v1363_v59, 1  ;;  %v1369_v4 = vperm.slane %v1363_v59, 2 }
 0x2e7   : > { %v1370_v62 = vperm.slane %v1363_v59, 3 }
 0x2e8   : > { %v1365_v63 = vsub.f32 %v1344_v31, %v1364_v60  ;;  %v1375_v0 = vmul.f32 %v1367_v61, %v3243_v5  ;;  %v1379_v1 = vmul.f32 %v1367_v61, %v3247_v12  ;;  %v1376_v2 = vmul.f32 %v1368_v6, %v3245_v9 }
 0x2e9   : > { %v1380_v14 = vmul.f32 %v1368_v6, %v3249_v19  ;;  %v1377_v3 = vmul.f32 %v1369_v4, %v3251_v22  ;;  %v1381_v16 = vmul.f32 %v1369_v4, %v3255_v29  ;;  %v1378_v15 = vmul.f32 %v1370_v62, %v3253_v26 }
 0x2ea   : > { %v1384_v17 = vperm.slane %v1365_v63, 0  ;;  %v1385_v7 = vperm.slane %v1365_v63, 1  ;;  %v1386_v8 = vperm.slane %v1365_v63, 2  ;;  %v1382_v10 = vmul.f32 %v1370_v62, %v3257_v33 }
 0x2eb   : > { %v1387_v11 = vperm.slane %v1365_v63, 3 }
 0x2ec   : > { %v1392_v13 = vadd.f32 %v1384_v17, %v1375_v0  ;;  %v1396_v5 = vadd.f32 %v1384_v17, %v1379_v1  ;;  %v1393_v18 = vadd.f32 %v1385_v7, %v1376_v2  ;;  %v1397_v12 = vadd.f32 %v1385_v7, %v1380_v14 }
 0x2ed   : > { %v1394_v20 = vadd.f32 %v1386_v8, %v1377_v3  ;;  %v1398_v9 = vadd.f32 %v1386_v8, %v1381_v16  ;;  %v1395_v21 = vadd.f32 %v1387_v11, %v1378_v15  ;;  %v1399_v19 = vadd.f32 %v1387_v11, %v1382_v10 }
 0x2ee   : > { %v1400_v23 = vmul.f32 0.2, %v1392_v13  ;;  %v1404_v22 = vmul.f32 0.2, %v1396_v5  ;;  %v1401_v24 = vmul.f32 0.2, %v1393_v18 }
 0x2ef   : > { %v1405_v29 = vmul.f32 0.2, %v1397_v12  ;;  %v1402_v27 = vmul.f32 0.2, %v1394_v20  ;;  %v1406_v26 = vmul.f32 0.2, %v1398_v9 }
 0x2f0   : > { %v1408_v28 = vmax.f32 %v1392_v13, %v1400_v23  ;;  %v1412_v30 = vmax.f32 %v1396_v5, %v1404_v22  ;;  %v1409_v32 = vmax.f32 %v1393_v18, %v1401_v24  ;;  %v1403_v34 = vmul.f32 0.2, %v1395_v21 }
 0x2f1   : > { %v1413_v33 = vmax.f32 %v1397_v12, %v1405_v29  ;;  %v1410_v35 = vmax.f32 %v1394_v20, %v1402_v27  ;;  %v1414_v36 = vmax.f32 %v1398_v9, %v1406_v26  ;;  %v1407_v37 = vmul.f32 0.2, %v1399_v19 }
 0x2f2   : > { %v1417_v38 = vpack.c.bf16 %v1412_v30, %v1408_v28  ;;  %v1411_v39 = vmax.f32 %v1395_v21, %v1403_v34 }
 0x2f3   : > { %v1418_v40 = vpack.c.bf16 %v1413_v33, %v1409_v32  ;;  %v1419_v42 = vpack.c.bf16 %v1414_v36, %v1410_v35  ;;  %v1415_v43 = vmax.f32 %v1399_v19, %v1407_v37 }
 0x2f4   : > { %1688 = vmatmul.bf16.vlgmr.msra.gmra.mxu0 %v1417_v38 }
 0x2f5   : > { %1702 = vmatmul.bf16.vlgmr.msra.gmra.mxu1 %v1418_v40  ;;  %1716 = vmatmul.bf16.vlgmr.msra.gmra.mxu2 %v1419_v42  ;;  %v1420_v44 = vpack.c.bf16 %v1415_v43, %v1411_v39 }
 0x2f7   : > { %1730 = vmatmul.bf16.vlgmr.msra.gmra.mxu3 %v1420_v44 }
 0x371   : > { %v1689_v46 = vpop.f32.mrf.mxu0 }
 0x372   : > { %v1690_v47 = vadd.f32 %v2669_v45, %v1689_v46  ;;  %v1703_v41 = vpop.f32.mrf.mxu1 }
 0x374   : > { %v1704_v48 = vadd.f32 %v1703_v41, %v1690_v47 }
 0x378   : > { %v1717_v25 = vpop.f32.mrf.mxu2 }
 0x379   : > { %v1718_v49 = vadd.f32 %v1717_v25, %v1704_v48  ;;  %v1691_v50 = vpop.f32.mrf.mxu0 }
 0x37a   : > { %v1731_v51 = vpop.f32.mrf.mxu3  ;;  %v1692_v53 = vadd.f32 %v2669_v45, %v1691_v50  ;;  %v1705_v54 = vpop.f32.mrf.mxu1 }
 0x37b   : > { %v1732_v52 = vadd.f32 %v1731_v51, %v1718_v49 }
 0x37c   : > { %v1706_v55 = vadd.f32 %v1705_v54, %v1692_v53 }
 0x37d   : > { %2672 = vtanh.f32 %v1732_v52 }
 0x380   : > { %v1719_v56 = vpop.f32.mrf.mxu2 }
 0x381   : > { %v1720_v57 = vadd.f32 %v1719_v56, %v1706_v55 }
 0x382   : > { %v1733_v58 = vpop.f32.mrf.mxu3 }
 0x383   : > { %v2673_v59 = vpop.eup %2672  ;;  %v1734_v31 = vadd.f32 %v1733_v58, %v1720_v57 }
 0x384   : > { %1738 = vst [vmem:[%s3195_s4] sm:$0xff] %v2673_v59 }
 0x385   : > { %2674 = vtanh.f32 %v1734_v31 }
 0x38b   : > { %v2675_v60 = vpop.eup %2674 }
 0x38c   : > { %1739 = vst [vmem:[%s3195_s4 + $0x8] sm:$0xff] %v2675_v60 }
 0x38d PF: > { %s3381_s18 = sld [smem:[#allocation28_spill]]  ;;  %s1753_s16 = sshll.u32 %s3195_s4, 4  ;;  %s1754_s16 = int_to_ptr.vmem [resolvable:$true] %s1753_s16 }
 0x38e   : > { %s1741_s3 = scalar_lea.sflag [#allocation8], %s3170_s5 }
 0x393   : > { %s1752_s9 = scalar_lea.hbm %s3381_s18, %s1908_s30  ;;  %s2876_s6 = scalar_lea.hbm %s3381_s18, 48 }
 0x394   : > { %s1755_s20 = sshll.u32 %s1752_s9, 4  ;;  %s1756_s20 = int_to_ptr.hbm [resolvable:$true] %s1755_s20 }
 0x395   : > { %s2870_s15 = sshra.s32 %s1756_s20, 4  ;;  %s2871_s15 = int_to_ptr.hbm [resolvable:$true] %s2870_s15 }
 0x396   : > { %s2872_s13 = scalar_lea.hbm %s2871_s15, 16  ;;  %p2877_p3 = scmp.lt.s32.totalorder %s2871_s15, %s3381_s18 }
 0x397   : > { %p2873_p4 = scmp.ne.s32.totalorder %s2871_s15, %s2872_s13  ;;  %p2878_p8 = scmp.lt.s32.totalorder %s2876_s6, %s2872_s13 }
 0x399   : > { %p2874_p5 = pnand %p2873_p4, %p3148_p2  ;;  %p2879_p9 = por %p2878_p8, %p2877_p3 }
 0x39b   : > { %p2875_p7 = pneg %p2874_p5 }
 0x39d   : > { %p2880_p10 = pnand %p2879_p9, %p2875_p7 }
 0x39f   : > { %2883 = shalt.err (!%p2880_p10)
}
 0x3a0   : > { %s2982_s5 = smov 128   ;;  %s2983_s17 = smov 8  }
 0x3a1   : > { %2549 = dma.vmem_to_hbm [thread:$0]  (%p3148_p2), %s1754_s16, 256, %s1756_s20, %s1741_s3, %s2982_s5, %s2982_s5, %s2983_s17  }
 0x3a2 PF: > { %p2586_p11 = scmp.ge.s32.totalorder %s2966_s28, 2  ;;  %s1770_s2 = sand.u32 1, %s2938_s21  }
 0x3a3   : > { %s1771_s4 = scalar_lea.sflag [#allocation8], %s1770_s2 }
 0x3a4   : > { %p2572_p1 = pnand %p2586_p11, %p3155_p6 }
 0x3a6   : > { %p2573_p12 = pneg %p2572_p1 }
 0x3a8   : > { %2933 = dma.done.wait (%p2573_p12), %s1771_s4, 256  }
 0x3a9   : > { %2935 = vsyncadd (%p2573_p12), %s1771_s4, 4294967040  ;;  %s25_s28 = sadd.s32 1, %s2966_s28   ;;  %s3382_s21 = smov %s2942_s22 }
 0x3aa   : > { %p22_p13 = scmp.ge.s32.totalorder %s25_s28, 11   ;;  %s3383_s22 = smov %s2946_s23 }
 0x3ab   : > { %s3384_s23 = smov %s3137_s19  ;;  %s3385_s24 = smov %s2958_s26 }
 0x3ac   : > { %s3386_s25 = smov %s2962_s27  ;;  %s3387_s26 = smov %s3390_s11 }
 0x3ad   : > { %s3388_s27 = smov %s3394_s14  ;;  %24 = sbr.rel (!%p22_p13) target bundleno = 17 (0x11), region = 133 }
 0x3b2   :  { %1777 = vsyncpa [#allocation7], 1 }
 0x3b3   :  { %1779 = vsyncpa [#allocation7 + $0x1], 1 }
 0x3b4   :  { %1780 = vsyncpa [#allocation10], 1 }
 0x3b5   :  { %1781 = vsyncpa [#allocation13], 1 }
 0x3b6   :  { %1782 = vsyncpa [#allocation16], 1 }
 0x3b7   :  { %1783 = vsyncpa [#allocation8], 1 }
 0x3b8   :  { %1785 = vsyncpa [#allocation8 + $0x1], 1 }

</bundles_post_ra>
